<compile_context>
chip_gen: v6e
topology: v6e:2x2x1
jax: 0.10.0
libtpu: 0.0.40
codegen_flags: <defaults>
</compile_context>

<pallas_src>
import jax
import jax.numpy as jnp
import numpy as np
from jax.experimental import pallas as pl
from jax.experimental.pallas import tpu as pltpu


# ----------------------------------------------------------------------------
# Pallas kernel: one (batch, row-tile) step of the 3x3 "same" conv
# ----------------------------------------------------------------------------

def _key_proj_kernel(x_mid_ref, x_top_ref, x_bot_ref, w_ref, b_ref, o_ref,
                     xrows_ref):
    """3x3 conv rows [r0, r0+th) of one batch element, nine K=cin matmuls.

    x_mid_ref:  (1, th, W, cin)   bf16  input rows [r0, r0+th)       (NHWC)
    x_top_ref:  (1, 1,  W, cin)   bf16  row r0-1 (clamped to 0 at the border)
    x_bot_ref:  (1, 1,  W, cin)   bf16  row r0+th (clamped to H-1 at the border)
    w_ref:      (9, cin, cout)    bf16  tap weights, tap t = dy*3 + dx
    b_ref:      (1, cout)         f32   bias
    o_ref:      (1, th, W, cout)  f32   output rows [r0, r0+th)
    xrows_ref:  (th+2, W, cin)    bf16  scratch: H-halo'd row slab
    """
    _, th, W, cin = x_mid_ref.shape
    cout = w_ref.shape[2]
    i = pl.program_id(1)

    # Assemble the H-halo'd slab.  All writes index the leading dim only, so
    # they are tile-aligned (no masked / sublane-offset stores).
    xrows_ref[0] = x_top_ref[0, 0]
    xrows_ref[pl.ds(1, th)] = x_mid_ref[0]
    xrows_ref[th + 1] = x_bot_ref[0, 0]

    @pl.when(i == 0)                          # top image border -> zero halo row
    def _():
        xrows_ref[0] = jnp.zeros((W, cin), x_mid_ref.dtype)

    @pl.when(i == pl.num_programs(1) - 1)     # bottom image border
    def _():
        xrows_ref[th + 1] = jnp.zeros((W, cin), x_mid_ref.dtype)

    xr = xrows_ref[...]                       # (th+2, W, cin) bf16

    # dx = 0 / 2 taps: shift the W (sublane) axis by +/-1 with a zero column.
    # Built once per step; all three dy taps reuse them via free leading-dim
    # slices.  No lane-dim relayout anywhere.
    zcol = jnp.zeros((th + 2, 1, cin), xr.dtype)
    x_lft = jnp.concatenate([zcol, xr[:, :W - 1, :]], axis=1)   # source col w-1
    x_rgt = jnp.concatenate([xr[:, 1:, :], zcol], axis=1)       # source col w+1
    taps = (x_lft, xr, x_rgt)

    # Nine accumulating K=cin matmuls; the f32 accumulator stays in registers
    # (th*W x cout f32 is a handful of vregs), stored to VMEM exactly once.
    acc = jnp.zeros((th * W, cout), jnp.float32)
    for dy in range(3):
        for dx in range(3):
            lhs = taps[dx][dy:dy + th].reshape(th * W, cin)
            acc = acc + jnp.dot(lhs, w_ref[dy * 3 + dx],
                                preferred_element_type=jnp.float32)

    out = acc + b_ref[...]
    o_ref[0] = out.reshape(th, W, cout).astype(o_ref.dtype)


# ----------------------------------------------------------------------------
# pallas_call wrappers
# ----------------------------------------------------------------------------

def key_projection_nhwc(x_nhwc, w_oihw, b, *, row_tile=8):
    """NHWC-native forward of KeyProjection (3x3 conv, padding=1)."""
    N, H, W, cin = x_nhwc.shape
    cout = w_oihw.shape[0]
    th = row_tile if (H % row_tile == 0) else H
    n_h = H // th

    # Layout plumbing only.
    x = x_nhwc.astype(jnp.bfloat16)                               # bf16 input DMA
    # OIHW -> (dy, dx, cin, cout) -> (9, cin, cout); tap index t = dy*3 + dx.
    w_k = jnp.transpose(w_oihw, (2, 3, 1, 0)).reshape(9, cin, cout)
    w_k = w_k.astype(jnp.bfloat16)
    b2 = b.reshape(1, cout).astype(jnp.float32)

    flops = 2 * N * H * W * 9 * cin * cout
    bytes_accessed = int(N * H * W * cin * 2 + 9 * cin * cout * 2 + cout * 4
                         + N * H * W * cout * 4)

    return pl.pallas_call(
        _key_proj_kernel,
        out_shape=jax.ShapeDtypeStruct((N, H, W, cout), jnp.float32),
        grid=(N, n_h),
        in_specs=[
            # Main row tile.
            pl.BlockSpec((1, th, W, cin), lambda n, i: (n, i, 0, 0)),
            # 1-row halo above / below (block size 1 along H => block index is
            # the row index); clamped at the border, zeroed in-kernel.
            pl.BlockSpec((1, 1, W, cin),
                         lambda n, i: (n, jnp.maximum(i * th - 1, 0), 0, 0)),
            pl.BlockSpec((1, 1, W, cin),
                         lambda n, i: (n, jnp.minimum((i + 1) * th, H - 1), 0, 0)),
            pl.BlockSpec((9, cin, cout), lambda n, i: (0, 0, 0)),
            pl.BlockSpec((1, cout), lambda n, i: (0, 0)),
        ],
        out_specs=pl.BlockSpec((1, th, W, cout), lambda n, i: (n, i, 0, 0)),
        scratch_shapes=[pltpu.VMEM((th + 2, W, cin), jnp.bfloat16)],
        compiler_params=pltpu.CompilerParams(
            dimension_semantics=("parallel", "parallel")),
        cost_estimate=pl.CostEstimate(
            flops=flops, transcendentals=0, bytes_accessed=bytes_accessed),
    )(x, x, x, w_k, b2)


def key_projection(x_nchw, w_oihw, b, *, row_tile=8):
    """PyTorch-parity interface: NCHW in / NCHW out.

    The two transposes are pure layout plumbing for nn.Conv2d's NCHW
    interface; a model that keeps activations NHWC should call
    key_projection_nhwc directly and skip both HBM round trips.
    """
    # TODO(synk): keep the surrounding STCN model NHWC end-to-end so these
    # wrapper transposes (one full HBM read+write of the activation each)
    # disappear entirely.
    out_nhwc = key_projection_nhwc(
        jnp.transpose(x_nchw, (0, 2, 3, 1)), w_oihw, b, row_tile=row_tile)
    return jnp.transpose(out_nhwc, (0, 3, 1, 2))


# ----------------------------------------------------------------------------
# Deterministic parameter init (mirrors nn.init.orthogonal_ / zeros_)
# ----------------------------------------------------------------------------

def init_params(key, indim, keydim):
    kw_, kb_ = jax.random.split(key)
    # Orthogonal rows of the (cout, cin*3*3) flattened weight, like
    # nn.init.orthogonal_.
    flat = jax.random.normal(kw_, (indim * 9, keydim), jnp.float32)
    q, _ = jnp.linalg.qr(flat)                    # orthonormal columns
    weight = q.T.reshape(keydim, indim, 3, 3)     # OIHW
    # The module zero-inits the bias; use a small nonzero bias so the kernel's
    # bias-add path is actually exercised by the correctness check.
    bias = 0.01 * jax.random.normal(kb_, (keydim,), jnp.float32)
    return weight, bias


# ----------------------------------------------------------------------------
# Pure-JAX reference (exact PyTorch semantics) for a sanity check
# ----------------------------------------------------------------------------

def _key_projection_ref(x_nchw, w_oihw, b):
    out = jax.lax.conv_general_dilated(
        x_nchw, w_oihw, window_strides=(1, 1), padding=((1, 1), (1, 1)),
        dimension_numbers=("NCHW", "OIHW", "NCHW"))
    return out + b.reshape(1, -1, 1, 1)


# ----------------------------------------------------------------------------
# Main
# ----------------------------------------------------------------------------

if __name__ == "__main__":
    key = jax.random.PRNGKey(0)
    kx, kp = jax.random.split(key)

    N, H, W = 2, 16, 16
    indim, keydim = 64, 64          # KeyProjection(indim=64, keydim=64), small test

    x = jax.random.normal(kx, (N, indim, H, W), jnp.float32)
    weight, bias = init_params(kp, indim, keydim)

    out = jax.block_until_ready(key_projection(x, weight, bias))
    assert out.shape == (N, keydim, H, W), out.shape

    ref = jax.block_until_ready(_key_projection_ref(x, weight, bias))
    np.testing.assert_allclose(np.asarray(out), np.asarray(ref),
                               rtol=2e-2, atol=2e-2)

    print("KERNEL_OK")
</pallas_src>

<mosaic_0001>
module attributes {stable_mosaic.version = 11 : i64} {
  func.func @_key_proj_kernel(%arg0: i32, %arg1: i32, %arg2: memref<1x8x16x64xbf16, #tpu.memory_space<vmem>>, %arg3: memref<1x1x16x64xbf16, #tpu.memory_space<vmem>>, %arg4: memref<1x1x16x64xbf16, #tpu.memory_space<vmem>>, %arg5: memref<9x64x64xbf16, #tpu.memory_space<vmem>>, %arg6: memref<1x64xf32, #tpu.memory_space<vmem>>, %arg7: memref<1x8x16x64xf32, #tpu.memory_space<vmem>>, %arg8: memref<10x16x64xbf16, #tpu.memory_space<vmem>>) attributes {dimension_semantics = [#tpu.dimension_semantics<parallel>, #tpu.dimension_semantics<parallel>], iteration_bounds = array<i64: 2, 2>, scalar_prefetch = 0 : i64, scratch_operands = 1 : i64, tpu.core_type = #tpu.core_type<tc>, window_params = [{transform_indices = @transform_0, window_bounds = array<i64: 1, 8, 16, 64>}, {transform_indices = @transform_1, window_bounds = array<i64: 1, 1, 16, 64>}, {transform_indices = @transform_2, window_bounds = array<i64: 1, 1, 16, 64>}, {pipeline_mode = #tpu.pipeline_mode<synchronous>, transform_indices = @transform_3, window_bounds = array<i64: 9, 64, 64>}, {pipeline_mode = #tpu.pipeline_mode<synchronous>, transform_indices = @transform_4, window_bounds = array<i64: 1, 64>}, {transform_indices = @transform_5, window_bounds = array<i64: 1, 8, 16, 64>}]} {
    %c0 = arith.constant 0 : index
    %c0_0 = arith.constant 0 : index
    %c0_1 = arith.constant 0 : index
    %c0_2 = arith.constant 0 : index
    %0 = vector.load %arg3[%c0, %c0_0, %c0_1, %c0_2] : memref<1x1x16x64xbf16, #tpu.memory_space<vmem>>, vector<1x1x16x64xbf16>
    %1 = vector.shape_cast %0 : vector<1x1x16x64xbf16> to vector<16x64xbf16>
    %c0_3 = arith.constant 0 : index
    %c0_4 = arith.constant 0 : index
    %c0_5 = arith.constant 0 : index
    %2 = vector.load %arg8[%c0_3, %c0_4, %c0_5] : memref<10x16x64xbf16, #tpu.memory_space<vmem>>, vector<1x16x64xbf16>
    %3 = vector.shape_cast %2 : vector<1x16x64xbf16> to vector<16x64xbf16>
    %4 = vector.shape_cast %1 : vector<16x64xbf16> to vector<1x16x64xbf16>
    tpu.vector_store %arg8[%c0_3, %c0_4, %c0_5], %4 {strides = array<i32>} : memref<10x16x64xbf16, #tpu.memory_space<vmem>>, vector<1x16x64xbf16>,
    %c0_6 = arith.constant 0 : index
    %c0_7 = arith.constant 0 : index
    %c0_8 = arith.constant 0 : index
    %c0_9 = arith.constant 0 : index
    %5 = vector.load %arg2[%c0_6, %c0_7, %c0_8, %c0_9] : memref<1x8x16x64xbf16, #tpu.memory_space<vmem>>, vector<1x8x16x64xbf16>
    %6 = vector.shape_cast %5 : vector<1x8x16x64xbf16> to vector<8x16x64xbf16>
    %c1 = arith.constant 1 : index
    %c0_10 = arith.constant 0 : index
    %c0_11 = arith.constant 0 : index
    %7 = vector.load %arg8[%c1, %c0_10, %c0_11] : memref<10x16x64xbf16, #tpu.memory_space<vmem>>, vector<8x16x64xbf16>
    tpu.vector_store %arg8[%c1, %c0_10, %c0_11], %6 {strides = array<i32>} : memref<10x16x64xbf16, #tpu.memory_space<vmem>>, vector<8x16x64xbf16>,
    %c0_12 = arith.constant 0 : index
    %c0_13 = arith.constant 0 : index
    %c0_14 = arith.constant 0 : index
    %c0_15 = arith.constant 0 : index
    %8 = vector.load %arg4[%c0_12, %c0_13, %c0_14, %c0_15] : memref<1x1x16x64xbf16, #tpu.memory_space<vmem>>, vector<1x1x16x64xbf16>
    %9 = vector.shape_cast %8 : vector<1x1x16x64xbf16> to vector<16x64xbf16>
    %c9 = arith.constant 9 : index
    %c0_16 = arith.constant 0 : index
    %c0_17 = arith.constant 0 : index
    %10 = vector.load %arg8[%c9, %c0_16, %c0_17] : memref<10x16x64xbf16, #tpu.memory_space<vmem>>, vector<1x16x64xbf16>
    %11 = vector.shape_cast %10 : vector<1x16x64xbf16> to vector<16x64xbf16>
    %12 = vector.shape_cast %9 : vector<16x64xbf16> to vector<1x16x64xbf16>
    tpu.vector_store %arg8[%c9, %c0_16, %c0_17], %12 {strides = array<i32>} : memref<10x16x64xbf16, #tpu.memory_space<vmem>>, vector<1x16x64xbf16>,
    %c0_i32 = arith.constant 0 : i32
    %13 = arith.cmpi eq, %arg1, %c0_i32 : i32
    %14 = arith.extui %13 : i1 to i32
    %c0_i32_18 = arith.constant 0 : i32
    %15 = arith.cmpi ne, %14, %c0_i32_18 : i32
    scf.if %15 {
      %cst_59 = arith.constant 0.000000e+00 : bf16
      %87 = vector.broadcast %cst_59 : bf16 to vector<16x64xbf16>
      %c0_60 = arith.constant 0 : index
      %c0_61 = arith.constant 0 : index
      %c0_62 = arith.constant 0 : index
      %88 = vector.load %arg8[%c0_60, %c0_61, %c0_62] : memref<10x16x64xbf16, #tpu.memory_space<vmem>>, vector<1x16x64xbf16>
      %89 = vector.shape_cast %88 : vector<1x16x64xbf16> to vector<16x64xbf16>
      %90 = vector.shape_cast %87 : vector<16x64xbf16> to vector<1x16x64xbf16>
      tpu.vector_store %arg8[%c0_60, %c0_61, %c0_62], %90 {strides = array<i32>} : memref<10x16x64xbf16, #tpu.memory_space<vmem>>, vector<1x16x64xbf16>,
    } else {
    }
    %c1_i32 = arith.constant 1 : i32
    %16 = arith.cmpi eq, %arg1, %c1_i32 : i32
    %17 = arith.extui %16 : i1 to i32
    %c0_i32_19 = arith.constant 0 : i32
    %18 = arith.cmpi ne, %17, %c0_i32_19 : i32
    scf.if %18 {
      %cst_59 = arith.constant 0.000000e+00 : bf16
      %87 = vector.broadcast %cst_59 : bf16 to vector<16x64xbf16>
      %c9_60 = arith.constant 9 : index
      %c0_61 = arith.constant 0 : index
      %c0_62 = arith.constant 0 : index
      %88 = vector.load %arg8[%c9_60, %c0_61, %c0_62] : memref<10x16x64xbf16, #tpu.memory_space<vmem>>, vector<1x16x64xbf16>
      %89 = vector.shape_cast %88 : vector<1x16x64xbf16> to vector<16x64xbf16>
      %90 = vector.shape_cast %87 : vector<16x64xbf16> to vector<1x16x64xbf16>
      tpu.vector_store %arg8[%c9_60, %c0_61, %c0_62], %90 {strides = array<i32>} : memref<10x16x64xbf16, #tpu.memory_space<vmem>>, vector<1x16x64xbf16>,
    } else {
    }
    %c0_20 = arith.constant 0 : index
    %c0_21 = arith.constant 0 : index
    %c0_22 = arith.constant 0 : index
    %19 = vector.load %arg8[%c0_20, %c0_21, %c0_22] : memref<10x16x64xbf16, #tpu.memory_space<vmem>>, vector<10x16x64xbf16>
    %cst = arith.constant 0.000000e+00 : bf16
    %20 = vector.broadcast %cst : bf16 to vector<10x1x64xbf16>
    %21 = vector.extract_strided_slice %19 {offsets = [0, 0, 0], sizes = [10, 15, 64], strides = [1, 1, 1]} : vector<10x16x64xbf16> to vector<10x15x64xbf16>
    %22 = tpu.concatenate %20, %21 in 1 : vector<10x1x64xbf16>, vector<10x15x64xbf16> -> vector<10x16x64xbf16>
    %23 = vector.extract_strided_slice %19 {offsets = [0, 1, 0], sizes = [10, 15, 64], strides = [1, 1, 1]} : vector<10x16x64xbf16> to vector<10x15x64xbf16>
    %24 = tpu.concatenate %23, %20 in 1 : vector<10x15x64xbf16>, vector<10x1x64xbf16> -> vector<10x16x64xbf16>
    %cst_23 = arith.constant 0.000000e+00 : f32
    %25 = vector.broadcast %cst_23 : f32 to vector<128x64xf32>
    %26 = vector.extract_strided_slice %22 {offsets = [0, 0, 0], sizes = [8, 16, 64], strides = [1, 1, 1]} : vector<10x16x64xbf16> to vector<8x16x64xbf16>
    %27 = vector.shape_cast %26 : vector<8x16x64xbf16> to vector<128x64xbf16>
    %c0_24 = arith.constant 0 : index
    %c0_25 = arith.constant 0 : index
    %c0_26 = arith.constant 0 : index
    %28 = vector.load %arg5[%c0_24, %c0_25, %c0_26] : memref<9x64x64xbf16, #tpu.memory_space<vmem>>, vector<1x64x64xbf16>
    %29 = vector.shape_cast %28 : vector<1x64x64xbf16> to vector<64x64xbf16>
    %cst_27 = arith.constant dense<0.000000e+00> : vector<128x64xf32>
    %30 = tpu.matmul %27, %29, %cst_27 {dimension_numbers = #tpu.dot_dimension_numbers<[1], [0], [0], [1], [0, 0, 1, 1], [], []>} : vector<128x64xbf16>, vector<64x64xbf16>, vector<128x64xf32> -> vector<128x64xf32>
    %31 = arith.addf %25, %30 : vector<128x64xf32>
    %32 = vector.extract_strided_slice %19 {offsets = [0, 0, 0], sizes = [8, 16, 64], strides = [1, 1, 1]} : vector<10x16x64xbf16> to vector<8x16x64xbf16>
    %33 = vector.shape_cast %32 : vector<8x16x64xbf16> to vector<128x64xbf16>
    %c1_28 = arith.constant 1 : index
    %c0_29 = arith.constant 0 : index
    %c0_30 = arith.constant 0 : index
    %34 = vector.load %arg5[%c1_28, %c0_29, %c0_30] : memref<9x64x64xbf16, #tpu.memory_space<vmem>>, vector<1x64x64xbf16>
    %35 = vector.shape_cast %34 : vector<1x64x64xbf16> to vector<64x64xbf16>
    %cst_31 = arith.constant dense<0.000000e+00> : vector<128x64xf32>
    %36 = tpu.matmul %33, %35, %cst_31 {dimension_numbers = #tpu.dot_dimension_numbers<[1], [0], [0], [1], [0, 0, 1, 1], [], []>} : vector<128x64xbf16>, vector<64x64xbf16>, vector<128x64xf32> -> vector<128x64xf32>
    %37 = arith.addf %31, %36 : vector<128x64xf32>
    %38 = vector.extract_strided_slice %24 {offsets = [0, 0, 0], sizes = [8, 16, 64], strides = [1, 1, 1]} : vector<10x16x64xbf16> to vector<8x16x64xbf16>
    %39 = vector.shape_cast %38 : vector<8x16x64xbf16> to vector<128x64xbf16>
    %c2 = arith.constant 2 : index
    %c0_32 = arith.constant 0 : index
    %c0_33 = arith.constant 0 : index
    %40 = vector.load %arg5[%c2, %c0_32, %c0_33] : memref<9x64x64xbf16, #tpu.memory_space<vmem>>, vector<1x64x64xbf16>
    %41 = vector.shape_cast %40 : vector<1x64x64xbf16> to vector<64x64xbf16>
    %cst_34 = arith.constant dense<0.000000e+00> : vector<128x64xf32>
    %42 = tpu.matmul %39, %41, %cst_34 {dimension_numbers = #tpu.dot_dimension_numbers<[1], [0], [0], [1], [0, 0, 1, 1], [], []>} : vector<128x64xbf16>, vector<64x64xbf16>, vector<128x64xf32> -> vector<128x64xf32>
    %43 = arith.addf %37, %42 : vector<128x64xf32>
    %44 = vector.extract_strided_slice %22 {offsets = [1, 0, 0], sizes = [8, 16, 64], strides = [1, 1, 1]} : vector<10x16x64xbf16> to vector<8x16x64xbf16>
    %45 = vector.shape_cast %44 : vector<8x16x64xbf16> to vector<128x64xbf16>
    %c3 = arith.constant 3 : index
    %c0_35 = arith.constant 0 : index
    %c0_36 = arith.constant 0 : index
    %46 = vector.load %arg5[%c3, %c0_35, %c0_36] : memref<9x64x64xbf16, #tpu.memory_space<vmem>>, vector<1x64x64xbf16>
    %47 = vector.shape_cast %46 : vector<1x64x64xbf16> to vector<64x64xbf16>
    %cst_37 = arith.constant dense<0.000000e+00> : vector<128x64xf32>
    %48 = tpu.matmul %45, %47, %cst_37 {dimension_numbers = #tpu.dot_dimension_numbers<[1], [0], [0], [1], [0, 0, 1, 1], [], []>} : vector<128x64xbf16>, vector<64x64xbf16>, vector<128x64xf32> -> vector<128x64xf32>
    %49 = arith.addf %43, %48 : vector<128x64xf32>
    %50 = vector.extract_strided_slice %19 {offsets = [1, 0, 0], sizes = [8, 16, 64], strides = [1, 1, 1]} : vector<10x16x64xbf16> to vector<8x16x64xbf16>
    %51 = vector.shape_cast %50 : vector<8x16x64xbf16> to vector<128x64xbf16>
    %c4 = arith.constant 4 : index
    %c0_38 = arith.constant 0 : index
    %c0_39 = arith.constant 0 : index
    %52 = vector.load %arg5[%c4, %c0_38, %c0_39] : memref<9x64x64xbf16, #tpu.memory_space<vmem>>, vector<1x64x64xbf16>
    %53 = vector.shape_cast %52 : vector<1x64x64xbf16> to vector<64x64xbf16>
    %cst_40 = arith.constant dense<0.000000e+00> : vector<128x64xf32>
    %54 = tpu.matmul %51, %53, %cst_40 {dimension_numbers = #tpu.dot_dimension_numbers<[1], [0], [0], [1], [0, 0, 1, 1], [], []>} : vector<128x64xbf16>, vector<64x64xbf16>, vector<128x64xf32> -> vector<128x64xf32>
    %55 = arith.addf %49, %54 : vector<128x64xf32>
    %56 = vector.extract_strided_slice %24 {offsets = [1, 0, 0], sizes = [8, 16, 64], strides = [1, 1, 1]} : vector<10x16x64xbf16> to vector<8x16x64xbf16>
    %57 = vector.shape_cast %56 : vector<8x16x64xbf16> to vector<128x64xbf16>
    %c5 = arith.constant 5 : index
    %c0_41 = arith.constant 0 : index
    %c0_42 = arith.constant 0 : index
    %58 = vector.load %arg5[%c5, %c0_41, %c0_42] : memref<9x64x64xbf16, #tpu.memory_space<vmem>>, vector<1x64x64xbf16>
    %59 = vector.shape_cast %58 : vector<1x64x64xbf16> to vector<64x64xbf16>
    %cst_43 = arith.constant dense<0.000000e+00> : vector<128x64xf32>
    %60 = tpu.matmul %57, %59, %cst_43 {dimension_numbers = #tpu.dot_dimension_numbers<[1], [0], [0], [1], [0, 0, 1, 1], [], []>} : vector<128x64xbf16>, vector<64x64xbf16>, vector<128x64xf32> -> vector<128x64xf32>
    %61 = arith.addf %55, %60 : vector<128x64xf32>
    %62 = vector.extract_strided_slice %22 {offsets = [2, 0, 0], sizes = [8, 16, 64], strides = [1, 1, 1]} : vector<10x16x64xbf16> to vector<8x16x64xbf16>
    %63 = vector.shape_cast %62 : vector<8x16x64xbf16> to vector<128x64xbf16>
    %c6 = arith.constant 6 : index
    %c0_44 = arith.constant 0 : index
    %c0_45 = arith.constant 0 : index
    %64 = vector.load %arg5[%c6, %c0_44, %c0_45] : memref<9x64x64xbf16, #tpu.memory_space<vmem>>, vector<1x64x64xbf16>
    %65 = vector.shape_cast %64 : vector<1x64x64xbf16> to vector<64x64xbf16>
    %cst_46 = arith.constant dense<0.000000e+00> : vector<128x64xf32>
    %66 = tpu.matmul %63, %65, %cst_46 {dimension_numbers = #tpu.dot_dimension_numbers<[1], [0], [0], [1], [0, 0, 1, 1], [], []>} : vector<128x64xbf16>, vector<64x64xbf16>, vector<128x64xf32> -> vector<128x64xf32>
    %67 = arith.addf %61, %66 : vector<128x64xf32>
    %68 = vector.extract_strided_slice %19 {offsets = [2, 0, 0], sizes = [8, 16, 64], strides = [1, 1, 1]} : vector<10x16x64xbf16> to vector<8x16x64xbf16>
    %69 = vector.shape_cast %68 : vector<8x16x64xbf16> to vector<128x64xbf16>
    %c7 = arith.constant 7 : index
    %c0_47 = arith.constant 0 : index
    %c0_48 = arith.constant 0 : index
    %70 = vector.load %arg5[%c7, %c0_47, %c0_48] : memref<9x64x64xbf16, #tpu.memory_space<vmem>>, vector<1x64x64xbf16>
    %71 = vector.shape_cast %70 : vector<1x64x64xbf16> to vector<64x64xbf16>
    %cst_49 = arith.constant dense<0.000000e+00> : vector<128x64xf32>
    %72 = tpu.matmul %69, %71, %cst_49 {dimension_numbers = #tpu.dot_dimension_numbers<[1], [0], [0], [1], [0, 0, 1, 1], [], []>} : vector<128x64xbf16>, vector<64x64xbf16>, vector<128x64xf32> -> vector<128x64xf32>
    %73 = arith.addf %67, %72 : vector<128x64xf32>
    %74 = vector.extract_strided_slice %24 {offsets = [2, 0, 0], sizes = [8, 16, 64], strides = [1, 1, 1]} : vector<10x16x64xbf16> to vector<8x16x64xbf16>
    %75 = vector.shape_cast %74 : vector<8x16x64xbf16> to vector<128x64xbf16>
    %c8 = arith.constant 8 : index
    %c0_50 = arith.constant 0 : index
    %c0_51 = arith.constant 0 : index
    %76 = vector.load %arg5[%c8, %c0_50, %c0_51] : memref<9x64x64xbf16, #tpu.memory_space<vmem>>, vector<1x64x64xbf16>
    %77 = vector.shape_cast %76 : vector<1x64x64xbf16> to vector<64x64xbf16>
    %cst_52 = arith.constant dense<0.000000e+00> : vector<128x64xf32>
    %78 = tpu.matmul %75, %77, %cst_52 {dimension_numbers = #tpu.dot_dimension_numbers<[1], [0], [0], [1], [0, 0, 1, 1], [], []>} : vector<128x64xbf16>, vector<64x64xbf16>, vector<128x64xf32> -> vector<128x64xf32>
    %79 = arith.addf %73, %78 : vector<128x64xf32>
    %c0_53 = arith.constant 0 : index
    %c0_54 = arith.constant 0 : index
    %80 = vector.load %arg6[%c0_53, %c0_54] : memref<1x64xf32, #tpu.memory_space<vmem>>, vector<1x64xf32>
    %81 = vector.broadcast %80 : vector<1x64xf32> to vector<128x64xf32>
    %82 = arith.addf %79, %81 : vector<128x64xf32>
    %83 = vector.shape_cast %82 : vector<128x64xf32> to vector<8x16x64xf32>
    %c0_55 = arith.constant 0 : index
    %c0_56 = arith.constant 0 : index
    %c0_57 = arith.constant 0 : index
    %c0_58 = arith.constant 0 : index
    %84 = vector.load %arg7[%c0_55, %c0_56, %c0_57, %c0_58] : memref<1x8x16x64xf32, #tpu.memory_space<vmem>>, vector<1x8x16x64xf32>
    %85 = vector.shape_cast %84 : vector<1x8x16x64xf32> to vector<8x16x64xf32>
    %86 = vector.shape_cast %83 : vector<8x16x64xf32> to vector<1x8x16x64xf32>
    tpu.vector_store %arg7[%c0_55, %c0_56, %c0_57, %c0_58], %86 {strides = array<i32>} : memref<1x8x16x64xf32, #tpu.memory_space<vmem>>, vector<1x8x16x64xf32>,
    return
  }
  func.func @transform_0(%arg0: i32, %arg1: i32) -> (i32, i32, i32, i32) {
    %c0_i32 = arith.constant 0 : i32
    %c0_i32_0 = arith.constant 0 : i32
    %c0_i32_1 = arith.constant 0 : i32
    return %arg0, %arg1, %c0_i32, %c0_i32_0 : i32, i32, i32, i32
  }
  func.func @transform_1(%arg0: i32, %arg1: i32) -> (i32, i32, i32, i32) {
    %c8_i32 = arith.constant 8 : i32
    %0 = arith.muli %arg1, %c8_i32 : i32
    %c1_i32 = arith.constant 1 : i32
    %1 = arith.subi %0, %c1_i32 : i32
    %c0_i32 = arith.constant 0 : i32
    %2 = arith.maxsi %1, %c0_i32 : i32
    %c0_i32_0 = arith.constant 0 : i32
    %c0_i32_1 = arith.constant 0 : i32
    %c0_i32_2 = arith.constant 0 : i32
    return %arg0, %2, %c0_i32_0, %c0_i32_1 : i32, i32, i32, i32
  }
  func.func @transform_2(%arg0: i32, %arg1: i32) -> (i32, i32, i32, i32) {
    %c1_i32 = arith.constant 1 : i32
    %0 = arith.addi %arg1, %c1_i32 : i32
    %c8_i32 = arith.constant 8 : i32
    %1 = arith.muli %0, %c8_i32 : i32
    %c15_i32 = arith.constant 15 : i32
    %2 = arith.minsi %1, %c15_i32 : i32
    %c0_i32 = arith.constant 0 : i32
    %c0_i32_0 = arith.constant 0 : i32
    %c0_i32_1 = arith.constant 0 : i32
    return %arg0, %2, %c0_i32, %c0_i32_0 : i32, i32, i32, i32
  }
  func.func @transform_3(%arg0: i32, %arg1: i32) -> (i32, i32, i32) {
    %c0_i32 = arith.constant 0 : i32
    %c0_i32_0 = arith.constant 0 : i32
    %c0_i32_1 = arith.constant 0 : i32
    %c0_i32_2 = arith.constant 0 : i32
    return %c0_i32, %c0_i32_0, %c0_i32_1 : i32, i32, i32
  }
  func.func @transform_4(%arg0: i32, %arg1: i32) -> (i32, i32) {
    %c0_i32 = arith.constant 0 : i32
    %c0_i32_0 = arith.constant 0 : i32
    %c0_i32_1 = arith.constant 0 : i32
    return %c0_i32, %c0_i32_0 : i32, i32
  }
  func.func @transform_5(%arg0: i32, %arg1: i32) -> (i32, i32, i32, i32) {
    %c0_i32 = arith.constant 0 : i32
    %c0_i32_0 = arith.constant 0 : i32
    %c0_i32_1 = arith.constant 0 : i32
    return %arg0, %arg1, %c0_i32, %c0_i32_0 : i32, i32, i32, i32
  }
}

</mosaic_0001>

<bundles_post_ra>
// kernel: tpu_custom_call.1
= control target key start
LH: loop header
LB: loop body
LE: loop exit
PB: predicated region body
PF: predicated region fallthrough
CT: control target
= control target key end

     0   :  { %s4146_s0 = inlined_call_operand.hbm [shape: bf16[2,16,16,64], index: 0, kind: input, shape index: {}]   ;;  %s4147_s1 = inlined_call_operand.hbm [shape: bf16[2,16,16,64], index: 1, kind: input, shape index: {}]   ;;  %s4148_s2 = inlined_call_operand.hbm [shape: bf16[2,16,16,64], index: 2, kind: input, shape index: {}]   ;;  %s4149_s3 = inlined_call_operand.hbm [shape: bf16[9,64,64], index: 3, kind: input, shape index: {}]   ;;  %s4150_s4 = inlined_call_operand.vmem [shape: f32[1,64], index: 4, kind: input, shape index: {}]   ;;  %s4151_s5 = inlined_call_operand.hbm [shape: f32[2,16,16,64], index: 5, kind: output, shape index: {}]  }
   0x1   :  { %4173 = sst [smem:[#allocation52_spill]] %s4146_s0 }
   0x2   :  { %4174 = sst [smem:[#allocation53_spill]] %s4147_s1 }
   0x3   :  { %4175 = sst [smem:[#allocation54_spill]] %s4148_s2 }
   0x4   :  { %4176 = sst [smem:[#allocation55_spill]] %s4149_s3 }
   0x5   :  { %4177 = sst [smem:[#allocation56_spill]] %s4150_s4 }
   0x6   :  { %4178 = sst [smem:[#allocation57_spill]] %s4151_s5 }
   0x7   :  { %10 = vsyncpa [#allocation4], 0 }
   0x8   :  { %12 = vsyncpa [#allocation4 + $0x1], 0 }
   0x9   :  { %13 = vsyncpa [#allocation7], 0 }
   0xa   :  { %15 = vsyncpa [#allocation7 + $0x1], 0 }
   0xb   :  { %16 = vsyncpa [#allocation10], 0 }
   0xc   :  { %17 = vsyncpa [#allocation5], 0 }
   0xd   :  { %19 = vsyncpa [#allocation5 + $0x1], 0  ;;  %s3234_s18 = smov 0   ;;  %s3236_s19 = smov 0  }
   0xe   :  { %s3238_s20 = smov 0   ;;  %s3240_s21 = smov 0  }
   0xf   :  { %s3242_s22 = smov 0   ;;  %s3244_s23 = smov 0  }
  0x10   :  { %s3246_s24 = smov 0   ;;  %s3248_s25 = smov 0  }
  0x11   :  { %s3250_s26 = smov 0   ;;  %s3252_s27 = smov 0  }
  0x12   :  { %s3254_s28 = smov 0   ;;  %s3256_s29 = smov 0  }
  0x13   :  { %s3258_s30 = smov 0   ;;  %s3260_s6 = smov 0  }
  0x14 LB: > { %4179 = sst [smem:[#allocation17_spill]] %s3139_s18  ;;  %s34_s7 = sadd.s32 1, %s3183_s29  ;;  %s3191_s6 = sphi %s3260_s6, %s25_s6   ;;  %s3187_s30 = sphi %s3258_s30, %s4289_s30   ;;  %s3183_s29 = sphi %s3256_s29, %s4288_s29   ;;  %s3179_s28 = sphi %s3254_s28, %s4298_s28   ;;  %s3175_s27 = sphi %s3252_s27, %s4286_s27   ;;  %s3171_s26 = sphi %s3250_s26, %s4297_s26   ;;  %s3167_s25 = sphi %s3248_s25, %s4296_s25   ;;  %s3163_s24 = sphi %s3246_s24, %s4295_s24   ;;  %s3159_s23 = sphi %s3244_s23, %s4294_s23   ;;  %s3155_s22 = sphi %s3242_s22, %s4293_s22   ;;  %s3151_s21 = sphi %s3240_s21, %s4292_s21   ;;  %s3147_s20 = sphi %s3238_s20, %s4291_s20   ;;  %s3143_s19 = sphi %s3236_s19, %s4281_s19   ;;  %s3139_s18 = sphi %s3234_s18, %s4280_s18  }
  0x15   : > { %4180 = sst [smem:[#allocation18_spill]] %s3143_s19  ;;  %s37_s8 = sadd.s32 1, %s3187_s30 }
  0x16   : > { %4181 = sst [smem:[#allocation19_spill]] %s3147_s20  ;;  %p35_p0 = scmp.ge.s32.totalorder %s34_s7, 2 }
  0x17   : > { %4182 = sst [smem:[#allocation20_spill]] %s3159_s23  ;;  %p4161_p1 = scmp.eq.s32.totalorder %s3191_s6, 0 }
  0x18   : > { %4183 = sst [smem:[#allocation21_spill]] %s3171_s26  ;;  %s2227_s9 = sshll.u32 %s3183_s29, 3 }
  0x19   : > { %4184 = sst [smem:[#allocation22_spill]] %s3175_s27  ;;  %s82_s10 = sadd.s32 1, %s3159_s23 }
  0x1a   : > { %4185 = sst [smem:[#allocation23_spill]] %s3179_s28  ;;  %s4300_s7 = smov (%p35_p0, %s34_s7), 0 }
  0x1b   : > { %4186 = sst [smem:[#allocation24_spill]] %s3183_s29  ;;  %s4302_s8 = smov (!%p35_p0, %s37_s8), %s3187_s30 }
  0x1c   : > { %4187 = sst [smem:[#allocation25_spill]] %s3187_s30  ;;  %s42_s11 = ssub.s32 %s3183_s29, %s4300_s7 }
  0x1d   : > { %4188 = sst [smem:[#allocation26_spill]] %s4300_s7  ;;  %s2228_s12 = sadd.s32 4294967295, %s2227_s9 }
  0x1e   : > { %p39_p2 = scmp.ge.s32.totalorder %s4302_s8, 2  ;;  %p71_p3 = scmp.gt.s32.totalorder %s2228_s12, 0 }
  0x1f   : > { %s2229_s13 = sshll.u32 %s4300_s7, 3  ;;  %p89_p4 = scmp.ne.s32.totalorder %s3159_s23, %s3155_s22 }
  0x20   : > { %s4304_s8 = smov (%p39_p2, %s4302_s8), 0  ;;  %s4306_s12 = smov (!%p71_p3, %s2228_s12), 0 }
  0x21   : > { %4189 = sst [smem:[#allocation27_spill]] %s4304_s8  ;;  %s3321_s14 = ssub.s32 %s3187_s30, %s4304_s8 }
  0x22   : > { %4190 = sst [smem:[#allocation28_spill]] %s3321_s14  ;;  %s2230_s15 = sadd.s32 4294967295, %s2229_s13 }
  0x23   : > { %s3324_s16 = sor.u32 %s42_s11, %s3321_s14  ;;  %p75_p5 = scmp.gt.s32.totalorder %s2230_s15, 0 }
  0x24   : > { %p44_p6 = scmp.eq.s32.totalorder %s3324_s16, 0  ;;  %p3329_p7 = por %p89_p4, %p4161_p1 }
  0x25   : > { %s4308_s15 = smov (!%p75_p5, %s2230_s15), 0  ;;  %p95_p8 = scmp.ne.s32.totalorder %s3155_s22, %s3151_s21 }
  0x26   : > { %s3335_s8 = sadd.s32 8, %s2227_s9  ;;  %s78_s7 = ssub.s32 %s4306_s12, %s4308_s15 }
  0x27   : > { %4192 = sst [smem:[#allocation29_spill]] %s3335_s8  ;;  %s79_s5 = sor.u32 %s78_s7, %s3321_s14 }
  0x28   : > { %s3339_s11 = sadd.s32 8, %s2229_s13  ;;  %p80_p10 = scmp.eq.s32.totalorder %s79_s5, 0 }
  0x29   : > { %p4160_p12 = scmp.lt.s32.totalorder %s3191_s6, 4  ;;  %s3347_s4 = sshll.u32 %s3187_s30, 5 }
  0x2a   : > { %s3343_s28 = scalar_select %p80_p10, %s3159_s23, %s82_s10  }
  0x2b   : > { %s265_s27 = sand.u32 1, %s3191_s6   ;;  %s267_s9 = sand.u32 1, %s3159_s23  }
  0x2c   : > { %4193 = sst [smem:[#allocation30_spill]] %s3343_s28  ;;  %s2241_s2 = sshll.u32 %s267_s9, 3 }
  0x2d   : > { %s2244_s18 = sshll.u32 %s4306_s12, 1  ;;  %s269_s7 = scalar_lea.vmem [#allocation6], %s2241_s2 }
  0x2e   : > { %s279_s15 = sadd.s32 %s2244_s18, %s3347_s4  ;;  %s282_s13 = sshll.u32 %s269_s7, 4  ;;  %s283_s13 = int_to_ptr.vmem [resolvable:$true] %s282_s13 }
  0x2f   : > { %s2246_s19 = sshll.u32 %s279_s15, 6  ;;  %s4194_s1 = sld [smem:[#allocation53_spill]] }
  0x30   : > { %p3359_p13 = pnand %p4160_p12, %p3329_p7  ;;  %s3363_s10 = scalar_lea.sflag [#allocation7], %s265_s27 }
  0x31   : > { %s2938_s18 = scalar_lea.vmem %s283_s13, 128  ;;  %s3193_s2 = smov [#allocation6]  }
  0x32   : > { %p2927_p0 = pneg %p3359_p13  ;;  %p2939_p2 = scmp.ne.s32.totalorder %s283_s13, %s2938_s18 }
  0x33   : > { %s2943_s12 = sshll.u32 %s3193_s2, 4  ;;  %s2944_s12 = int_to_ptr.vmem [resolvable:$false] %s2943_s12 }
  0x34   : > { %p2941_p3 = pnand %p2939_p2, %p2927_p0  ;;  %p2946_p5 = scmp.lt.s32.totalorder %s283_s13, %s2944_s12 }
  0x35   : > { %s281_s20 = scalar_lea.hbm %s4194_s1, %s2246_s19  ;;  %s2945_s19 = scalar_lea.vmem %s2944_s12, 256 }
  0x36   : > { %p2942_p4 = pneg %p2941_p3  ;;  %p2947_p10 = scmp.lt.s32.totalorder %s2945_s19, %s2938_s18 }
  0x38   : > { %p2948_p11 = por %p2947_p10, %p2946_p5 }
  0x3a   : > { %p2949_p7 = pnand %p2948_p11, %p2942_p4 }
  0x3c   : > { %2952 = shalt.err (!%p2949_p7)
}
  0x3d   : > { %s4162_s8 = smov 64   ;;  %s4164_s27 = smov 4  }
  0x3e   : > { %2748 = dma.hbm_to_vmem [thread:$0]  (!%p3359_p13), %s281_s20, 128, %s283_s13, %s3363_s10, %s4162_s8, %s4162_s8, %s4164_s27  }
  0x3f   : > { %s3374_s14 = sadd.s32 4294967295, %s3191_s6   ;;  %p2233_p11 = scmp.ge.s32.totalorder %s3191_s6, 1 }
  0x40   : > { %p4167_p0 = scmp.eq.s32.totalorder %s3374_s14, 0  ;;  %p212_p3 = scmp.lt.s32.totalorder %s3191_s6, 5 }
  0x41   : > { %s3196_s20 = smov [#allocation9]   ;;  %s2226_s7 = sadd.s32 4294967294, %s3191_s6  }
  0x42   : > { %p3385_p4 = por %p95_p8, %p4167_p0  ;;  %p3389_p5 = pnand %p2233_p11, %p212_p3 }
  0x43   : > { %s224_s15 = sshll.u32 %s3196_s20, 4  ;;  %s46_s13 = sadd.s32 1, %s3171_s26  ;;  %s225_s15 = int_to_ptr.vmem [resolvable:$true] %s224_s15 }
  0x44   : > { %p2738_p13 = pneg %p3389_p5  ;;  %s2964_s21 = scalar_lea.vmem %s225_s15, 4608 }
  0x45   : > { %p2965_p8 = scmp.ne.s32.totalorder %s225_s15, %s2964_s21  ;;  %p2972_p2 = scmp.lt.s32.totalorder %s225_s15, %s225_s15 }
  0x46   : > { %p2739_p10 = pnand %p2738_p13, %p4167_p0  ;;  %p2973_p11 = scmp.lt.s32.totalorder %s2964_s21, %s2964_s21 }
  0x48   : > { %p2955_p7 = pneg %p2739_p10  ;;  %p2974_p3 = por %p2973_p11, %p2972_p2 }
  0x4a   : > { %p2967_p9 = pnand %p2965_p8, %p2955_p7 }
  0x4c   : > { %p2968_p12 = pneg %p2967_p9 }
  0x4e   : > { %p2975_p1 = pnand %p2974_p3, %p2968_p12 }
  0x50   : > { %2978 = shalt.err (!%p2975_p1)
}
  0x51   : > { %s4198_s3 = sld [smem:[#allocation55_spill]]  ;;  %p53_p1 = scmp.ne.s32.totalorder %s3171_s26, %s3167_s25 }
  0x52   : > { %s3408_s2 = scalar_select %p44_p6, %s3171_s26, %s46_s13  }
  0x53   : > { %p59_p9 = scmp.ne.s32.totalorder %s3167_s25, %s3163_s24  ;;  %p205_p12 = scmp.eq.s32.totalorder %s2226_s7, 3 }
  0x54   : > { %4199 = sst [smem:[#allocation31_spill]] %s3408_s2  ;;  %s241_s12 = sand.u32 1, %s3171_s26  }
  0x55   : > { %p4200_p2 = scmp.eq.s32.totalorder %s3191_s6, 0  ;;  %p3419_p7 = por %p4167_p0, %p59_p9 }
  0x56   : > { %p4202_p8 = scmp.eq.s32.totalorder %s3374_s14, 3  ;;  %s2390_s13 = sshll.u32 %s3183_s29, 4 }
  0x57   : > { %2741 = dma.hbm_to_vmem [thread:$0]  (!%p2739_p10), %s4198_s3, 4608, %s225_s15, [#allocation10], %s4162_s8, %s4162_s8, %s4164_s27  }
  0x58   : > { %p55_p13 = por %p4200_p2, %p53_p1  ;;  %p3425_p11 = por %p4202_p8, %p53_p1 }
  0x59   : > { %p3429_p10 = por %p205_p12, %p59_p9  ;;  %s2236_s15 = sshll.u32 %s241_s12, 6 }
  0x5a   : > { %s4203_s20 = scalar_select %p3425_p11, 1, 0 }
  0x5b   : > { %s4204_s16 = scalar_select %p3429_p10, 1, 0 }
  0x5c   : > { %s252_s7 = sadd.s32 %s2390_s13, %s3347_s4  ;;  %s245_s21 = scalar_lea.vmem [#allocation3], %s2236_s15 }
  0x5d   : > { %s255_s5 = sshll.u32 %s245_s21, 4  ;;  %s2240_s18 = sshll.u32 %s252_s7, 6  ;;  %s256_s5 = int_to_ptr.vmem [resolvable:$true] %s255_s5 }
  0x5e   : > { %s4205_s0 = sld [smem:[#allocation52_spill]]  ;;  %p4206_p6 = scmp.lt.s32.totalorder %s3191_s6, 4 }
  0x5f   : > { %s242_s30 = scalar_lea.sflag [#allocation4], %s241_s12  ;;  %s2992_s2 = scalar_lea.vmem %s256_s5, 1024 }
  0x60   : > { %p3440_p3 = pnand %p4206_p6, %p55_p13  ;;  %p2993_p9 = scmp.ne.s32.totalorder %s256_s5, %s2992_s2 }
  0x61   : > { %s3197_s15 = smov [#allocation3]  }
  0x62   : > { %p2981_p1 = pneg %p3440_p3  ;;  %s2997_s13 = sshll.u32 %s3197_s15, 4  ;;  %s2998_s13 = int_to_ptr.vmem [resolvable:$false] %s2997_s13 }
  0x63   : > { %s2999_s7 = scalar_lea.vmem %s2998_s13, 2048  ;;  %p3000_p8 = scmp.lt.s32.totalorder %s256_s5, %s2998_s13 }
  0x64   : > { %s254_s1 = scalar_lea.hbm %s4205_s0, %s2240_s18  ;;  %p2995_p12 = pnand %p2993_p9, %p2981_p1 }
  0x65   : > { %p3001_p0 = scmp.lt.s32.totalorder %s2999_s7, %s2992_s2 }
  0x66   : > { %p2996_p2 = pneg %p2995_p12 }
  0x67   : > { %p3002_p10 = por %p3001_p0, %p3000_p8 }
  0x69   : > { %p3003_p11 = pnand %p3002_p10, %p2996_p2 }
  0x6b   : > { %3006 = shalt.err (!%p3003_p11)
}
  0x6c   : > { %s4208_s8 = smov 4   ;;  %s4209_s27 = smov 64  }
  0x6d   : > { %s4210_s12 = sld [smem:[#allocation19_spill]]  ;;  %p4216_p13 = scmp.lt.s32.totalorder %s3339_s11, 15 }
  0x6e   : > { %s4211_s21 = sld [smem:[#allocation29_spill]]  ;;  %p4217_p6 = scmp.eq.s32.totalorder %s3191_s6, 0 }
  0x6f   : > { %s4212_s18 = sld [smem:[#allocation18_spill]]  ;;  %s4312_s11 = smov (!%p4216_p13, %s3339_s11), 15 }
  0x70   : > { %s4213_s15 = sld [smem:[#allocation17_spill]]  ;;  %p4218_p12 = scmp.eq.s32.totalorder %s3374_s14, 0 }
  0x71   : > { %s4214_s13 = sld [smem:[#allocation28_spill]] }
  0x72   : > { %2745 = dma.hbm_to_vmem [thread:$0]  (!%p3440_p3), %s254_s1, 1024, %s256_s5, %s242_s30, %s4209_s27, %s4209_s27, %s4208_s8  }
  0x73   : > { %s118_s3 = sadd.s32 1, %s4210_s12  ;;  %s294_s7 = sand.u32 1, %s4210_s12  }
  0x74   : > { %p4215_p0 = scmp.lt.s32.totalorder %s4211_s21, 15  ;;  %s2247_s1 = sshll.u32 %s294_s7, 3 }
  0x75   : > { %p125_p11 = scmp.ne.s32.totalorder %s4210_s12, %s4212_s18  ;;  %s296_s28 = scalar_lea.vmem [#allocation8], %s2247_s1 }
  0x76   : > { %s4310_s21 = smov (!%p4215_p0, %s4211_s21), 15  ;;  %p131_p10 = scmp.ne.s32.totalorder %s4212_s18, %s4213_s15 }
  0x77   : > { %s114_s2 = ssub.s32 %s4310_s21, %s4312_s11  ;;  %p127_p1 = por %p125_p11, %p4217_p6 }
  0x78   : > { %s115_s0 = sor.u32 %s114_s2, %s4214_s13  ;;  %p3468_p2 = por %p131_p10, %p4218_p12 }
  0x79   : > { %p116_p9 = scmp.eq.s32.totalorder %s115_s0, 0  ;;  %s2249_s30 = sshll.u32 %s4310_s21, 1 }
  0x7a   : > { %s4219_s29 = scalar_select %p3468_p2, 1, 0 }
  0x7b   : > { %s4314_s12 = smov (!%p116_p9, %s4210_s12), %s118_s3  ;;  %s306_s5 = sadd.s32 %s2249_s30, %s3347_s4 }
  0x7c   : > { %s2251_s26 = sshll.u32 %s306_s5, 6  ;;  %s309_s18 = sshll.u32 %s296_s28, 4  ;;  %s310_s18 = int_to_ptr.vmem [resolvable:$true] %s309_s18 }
  0x7d   : > { %s4220_s23 = sld [smem:[#allocation54_spill]]  ;;  %p4221_p3 = scmp.lt.s32.totalorder %s3191_s6, 4 }
  0x7e   : > { %s3020_s21 = scalar_lea.vmem %s310_s18, 128  ;;  %s3198_s4 = smov [#allocation8]  }
  0x7f   : > { %p3481_p8 = pnand %p4221_p3, %p127_p1  ;;  %p3021_p13 = scmp.ne.s32.totalorder %s310_s18, %s3020_s21 }
  0x80   : > { %s3025_s3 = sshll.u32 %s3198_s4, 4  ;;  %s3026_s3 = int_to_ptr.vmem [resolvable:$false] %s3025_s3 }
  0x81   : > { %p3009_p0 = pneg %p3481_p8  ;;  %s3027_s28 = scalar_lea.vmem %s3026_s3, 256 }
  0x82   : > { %p3028_p6 = scmp.lt.s32.totalorder %s310_s18, %s3026_s3  ;;  %p3029_p9 = scmp.lt.s32.totalorder %s3027_s28, %s3020_s21 }
  0x83   : > { %s308_s13 = scalar_lea.hbm %s4220_s23, %s2251_s26  ;;  %p3023_p11 = pnand %p3021_p13, %p3009_p0 }
  0x84   : > { %p3030_p12 = por %p3029_p9, %p3028_p6 }
  0x85   : > { %p3024_p10 = pneg %p3023_p11 }
  0x87   : > { %p3031_p2 = pnand %p3030_p12, %p3024_p10 }
  0x89   : > { %3034 = shalt.err (!%p3031_p2)
}
  0x8a   : > { %2751 = dma.hbm_to_vmem [thread:$0]  (!%p3481_p8), %s308_s13, 128, %s310_s18, %s3363_s10, %s4209_s27, %s4209_s27, %s4208_s8  }
  0x8b   : > { %321 = sbr.rel (%p3389_p5) target bundleno = 580 (0x244), region = 40 }
  0x90   : > { %s3496_s23 = sand.u32 1, %s3167_s25  }
  0x91   : > { %s2253_s26 = sshll.u32 %s3496_s23, 6  ;;  %s324_s2 = scalar_lea.sflag [#allocation4], %s3496_s23 }
  0x92   : > { %s3500_s7 = scalar_lea.vmem [#allocation3], %s2253_s26 }
  0x93   : > { %3118 = dma.done.wait (%p3419_p7), %s324_s2, 1024  }
  0x94   : > { %3120 = vsyncadd (%p3419_p7), %s324_s2, 4294966272  ;;  %s332_s10 = sand.u32 1, %s3374_s14   ;;  %s334_s9 = sand.u32 1, %s3155_s22  }
  0x95   : > { %s2254_s8 = sshll.u32 %s334_s9, 3  ;;  %s333_s27 = scalar_lea.sflag [#allocation7], %s332_s10 }
  0x96   : > { %s336_s1 = scalar_lea.vmem [#allocation6], %s2254_s8 }
  0x97   : > { %3122 = dma.done.wait (%p3385_p4), %s333_s27, 128  }
  0x98   : > { %3124 = vsyncadd (%p3385_p4), %s333_s27, 4294967168  ;;  %s4223_s30 = sld [smem:[#allocation18_spill]]  ;;  %p4224_p5 = scmp.ne.s32.totalorder %s4219_s29, 0 }
  0x9e   : > { %s343_s5 = sand.u32 1, %s4223_s30  }
  0x9f   : > { %s3513_s18 = sshll.u32 %s343_s5, 3 }
  0xa0   : > { %s345_s19 = scalar_lea.vmem [#allocation8], %s3513_s18 }
  0xa1   : > { %3126 = dma.done.wait (%p4224_p5), %s333_s27, 128  }
  0xa2   : > { %3128 = vsyncadd (%p4224_p5), %s333_s27, 4294967168  ;;  %p4225_p7 = scmp.eq.s32.totalorder %s3374_s14, 0 }
  0xa4   : > { %3130 = dma.done.wait (%p4225_p7), [#allocation10], 4608   ;;  %p4226_p1 = pmov %p4225_p7 }
  0xa5   : > { %s2257_s17 = sshll.u32 %s3496_s23, 7  ;;  %vm399_vm0 = vcmask 519168   ;;  %v397_v0 = vld [vmem:[%s336_s1] sm:$0xf]  ;;  %v398_v1 = vld [vmem:[%s336_s1 + $0x4] sm:$0xf] }
  0xa6   : > { %3132 = vsyncadd (%p4226_p1), [#allocation10], 4294962688  ;;  %v402_v2 = vld [vmem:[%s3500_s7] sm:$0xf]  ;;  %400 = vst.msk [vmem:[#allocation2] sm:$0xf] %vm399_vm0, %v397_v0 }
  0xa7   : > { %401 = vst.msk [vmem:[#allocation2 + $0x4] sm:$0xf] %vm399_vm0, %v398_v1  ;;  %419 = vst.msk [vmem:[#allocation2 + $0x8] sm:$0xf] %vm399_vm0, %v402_v2  ;;  %v403_v3 = vld [vmem:[%s3500_s7 + $0x4] sm:$0xf] }
  0xa8   : > { %v404_v4 = vld [vmem:[%s3500_s7 + $0x8] sm:$0xf]  ;;  %v405_v5 = vld [vmem:[%s3500_s7 + $0xc] sm:$0xf]  ;;  %420 = vst.msk [vmem:[#allocation2 + $0xc] sm:$0xf] %vm399_vm0, %v403_v3 }
  0xa9   : > { %421 = vst.msk [vmem:[#allocation2 + $0x10] sm:$0xf] %vm399_vm0, %v404_v4  ;;  %422 = vst.msk [vmem:[#allocation2 + $0x14] sm:$0xf] %vm399_vm0, %v405_v5  ;;  %v406_v6 = vld [vmem:[%s3500_s7 + $0x10] sm:$0xf] }
  0xaa   : > { %v407_v7 = vld [vmem:[%s3500_s7 + $0x14] sm:$0xf]  ;;  %v408_v8 = vld [vmem:[%s3500_s7 + $0x18] sm:$0xf]  ;;  %423 = vst.msk [vmem:[#allocation2 + $0x18] sm:$0xf] %vm399_vm0, %v406_v6 }
  0xab   : > { %424 = vst.msk [vmem:[#allocation2 + $0x1c] sm:$0xf] %vm399_vm0, %v407_v7  ;;  %425 = vst.msk [vmem:[#allocation2 + $0x20] sm:$0xf] %vm399_vm0, %v408_v8  ;;  %v409_v9 = vld [vmem:[%s3500_s7 + $0x1c] sm:$0xf] }
  0xac   : > { %v410_v10 = vld [vmem:[%s3500_s7 + $0x20] sm:$0xf]  ;;  %v411_v11 = vld [vmem:[%s3500_s7 + $0x24] sm:$0xf]  ;;  %426 = vst.msk [vmem:[#allocation2 + $0x24] sm:$0xf] %vm399_vm0, %v409_v9 }
  0xad   : > { %427 = vst.msk [vmem:[#allocation2 + $0x28] sm:$0xf] %vm399_vm0, %v410_v10  ;;  %428 = vst.msk [vmem:[#allocation2 + $0x2c] sm:$0xf] %vm399_vm0, %v411_v11  ;;  %v412_v12 = vld [vmem:[%s3500_s7 + $0x28] sm:$0xf] }
  0xae   : > { %v413_v13 = vld [vmem:[%s3500_s7 + $0x2c] sm:$0xf]  ;;  %v414_v14 = vld [vmem:[%s3500_s7 + $0x30] sm:$0xf]  ;;  %429 = vst.msk [vmem:[#allocation2 + $0x30] sm:$0xf] %vm399_vm0, %v412_v12 }
  0xaf   : > { %430 = vst.msk [vmem:[#allocation2 + $0x34] sm:$0xf] %vm399_vm0, %v413_v13  ;;  %431 = vst.msk [vmem:[#allocation2 + $0x38] sm:$0xf] %vm399_vm0, %v414_v14  ;;  %v415_v15 = vld [vmem:[%s3500_s7 + $0x34] sm:$0xf] }
  0xb0   : > { %v416_v16 = vld [vmem:[%s3500_s7 + $0x38] sm:$0xf]  ;;  %v417_v17 = vld [vmem:[%s3500_s7 + $0x3c] sm:$0xf]  ;;  %432 = vst.msk [vmem:[#allocation2 + $0x3c] sm:$0xf] %vm399_vm0, %v415_v15 }
  0xb1   : > { %433 = vst.msk [vmem:[#allocation2 + $0x40] sm:$0xf] %vm399_vm0, %v416_v16  ;;  %434 = vst.msk [vmem:[#allocation2 + $0x44] sm:$0xf] %vm399_vm0, %v417_v17  ;;  %v435_v18 = vld [vmem:[%s345_s19] sm:$0xf] }
  0xb2   : > { %v436_v19 = vld [vmem:[%s345_s19 + $0x4] sm:$0xf]  ;;  %438 = vst.msk [vmem:[#allocation2 + $0x48] sm:$0xf] %vm399_vm0, %v435_v18  ;;  %s3567_s29 = scalar_lea.vmem [#allocation11], %s2257_s17  ;;  %s4227_s14 = sld [smem:[#allocation22_spill]] }
  0xb3   : > { %439 = vst.msk [vmem:[#allocation2 + $0x4c] sm:$0xf] %vm399_vm0, %v436_v19 }
  0xb8   : > { %p2258_p4 = scmp.ne.s32.totalorder %s4227_s14, 0 }
  0xba   : > { %443 = sbr.rel (%p2258_p4) target bundleno = 193 (0xc1), region = 60 }
  0xbf   : > { %v3199_v20 = vmov 0  }
  0xc0   : > { %444 = vst.msk [vmem:[#allocation2] sm:$0xf] %vm399_vm0, %v3199_v20  ;;  %445 = vst.msk [vmem:[#allocation2 + $0x4] sm:$0xf] %vm399_vm0, %v3199_v20 }
  0xc1 PF: > { %s4228_s15 = sld [smem:[#allocation22_spill]] }
  0xc7   : > { %p2259_p2 = scmp.ne.s32.totalorder %s4228_s15, 1 }
  0xc9   : > { %449 = sbr.rel (%p2259_p2) target bundleno = 208 (0xd0), region = 64 }
  0xce   : > { %v3200_v21 = vmov 0  }
  0xcf   : > { %450 = vst.msk [vmem:[#allocation2 + $0x48] sm:$0xf] %vm399_vm0, %v3200_v21  ;;  %451 = vst.msk [vmem:[#allocation2 + $0x4c] sm:$0xf] %vm399_vm0, %v3200_v21 }
  0xd0 PF: > { %v2879_v22 = vld [vmem:[#allocation9 + $0x38] sm:$0xff]   ;;  %v2880_v23 = vld [vmem:[#allocation9 + $0x30] sm:$0xff]   ;;  %v2881_v24 = vld [vmem:[#allocation9 + $0x28] sm:$0xff]   ;;  %vm699_vm1 = vcmask 523264   ;;  %vm602_vm2 = vcmask 1040384   ;;  %vm645_vm3 = vcmask 1047552  }
  0xd1   : > { %2502 = vmatprep.subr.bf16.mxu0 %v2879_v22  ;;  %2718 = vmatprep.subr.bf16.mxu1 %v2879_v22  ;;  %v2883_v25 = vld [vmem:[#allocation2] sm:$0xff]   ;;  %v2882_v27 = vld [vmem:[#allocation9 + $0x20] sm:$0xff]   ;;  %v2887_v29 = vld [vmem:[#allocation9 + $0x18] sm:$0xff]   ;;  %vm603_vm4 = vsmask.f32 256  ;;  %s4253_s0 = sld [smem:[#allocation56_spill]] }
  0xd2   : > { %2503 = vmatpush3.bf16.msra.mxu0 %v2879_v22  ;;  %2722 = vmatpush3.bf16.msra.mxu1 %v2879_v22  ;;  %v3575_v26 = vld [vmem:[#allocation2 + $0x20] sm:$0xff]   ;;  %v523_v28 = vshrl.u32 %v2883_v25, 16  ;;  %v3580_v30 = vld [vmem:[#allocation2 + $0x8] sm:$0xff]   ;;  %v526_v32 = vshll.u32 %v2883_v25, 16  ;;  %v3584_v37 = vld [vmem:[#allocation2 + $0x10] sm:$0xff]   ;;  %s4274_s21 = sld [smem:[#allocation22_spill]] }
  0xd3   : > { %2504 = vmatprep.subr.bf16.mxu0 %v2880_v23  ;;  %2719 = vmatprep.subr.bf16.mxu1 %v2880_v23  ;;  %v2888_v31 = vld [vmem:[#allocation9 + $0x58] sm:$0xff]   ;;  %v2889_v34 = vld [vmem:[#allocation9 + $0x10] sm:$0xff]   ;;  %v3586_v39 = vld [vmem:[#allocation2 + $0x30] sm:$0xff]   ;;  %v530_v40 = vshrl.u32 %v3580_v30, 16  ;;  %v533_v43 = vshll.u32 %v3580_v30, 16  ;;  %v537_v45 = vshrl.u32 %v3584_v37, 16 }
  0xd4   : > { %2510 = vmatprep.mubr.msk.bf16.mxu0 %vm699_vm1, %v2883_v25  ;;  %2518 = vmatprep.mubr.msk.bf16.mxu1 %vm699_vm1, %v3575_v26  ;;  %v3582_v33 = vld [vmem:[#allocation2 + $0x28] sm:$0xff]   ;;  %v2890_v35 = vld [vmem:[#allocation9 + $0x50] sm:$0xff]   ;;  %v525_v36 = vrot.slane %v523_v28, 7  ;;  %v615_v38 = vrot.slane %v526_v32, 1  ;;  %v3593_v41 = vld [vmem:[#allocation2 + $0x18] sm:$0xff]   ;;  %v540_v47 = vshll.u32 %v3584_v37, 16 }
  0xd5   : > { %v2895_v42 = vld [vmem:[#allocation9 + $0x8] sm:$0xff]   ;;  %vm646_vm5 = vsmask.f32 7424  ;;  %vm3605_vm6 = vmand %vm602_vm2, %vm603_vm4  ;;  %v544_v51 = vshrl.u32 %v3593_v41, 16  ;;  %v547_v52 = vshll.u32 %v3593_v41, 16  ;;  %v2897_v53 = vld [vmem:[#allocation9] sm:$0xff]  }
  0xd6   : > { %2505 = vmatpush3.bf16.msra.mxu0 %v2880_v23  ;;  %2723 = vmatpush3.bf16.msra.mxu1 %v2880_v23  ;;  %v2896_v44 = vld [vmem:[#allocation9 + $0x48] sm:$0xff]   ;;  %v528_v48 = vor.u32 %v526_v32, %v525_v36  ;;  %v616_v50 = vor.u32 %v615_v38, %v523_v28  ;;  %v2898_v54 = vld [vmem:[#allocation9 + $0x40] sm:$0xff]   ;;  %vm3612_vm7 = vmand %vm645_vm3, %vm646_vm5  ;;  %v532_v56 = vrot.slane %v530_v40, 7  ;;  %v617_v57 = vrot.slane %v533_v43, 1  ;;  %s4275_s4 = sld [smem:[#allocation23_spill]]  ;;  %s2076_s7 = sshll.u32 %s3567_s29, 4  ;;  %s4064_s7 = int_to_ptr.vmem [resolvable:$true] %s2076_s7 }
  0xd7   : > { %2506 = vmatprep.subr.bf16.mxu0 %v2881_v24  ;;  %2720 = vmatprep.subr.bf16.mxu1 %v2881_v24  ;;  %v3601_v46 = vld [vmem:[#allocation2 + $0x38] sm:$0xff]   ;;  %v539_v58 = vrot.slane %v537_v45, 7  ;;  %v619_v59 = vrot.slane %v540_v47, 1  ;;  %v546_v62 = vrot.slane %v544_v51, 7  ;;  %v621_v63 = vrot.slane %v547_v52, 1  ;;  %v2899_v4 = vld [vmem:[#allocation9 + $0x78] sm:$0xff]  }
  0xd8   : > { %v605_v60 = vsel %vm3605_vm6, 0, %v528_v48  ;;  %v648_v61 = vsel %vm3612_vm7, %v616_v50, 0  ;;  %v535_v0 = vor.u32 %v533_v43, %v532_v56  ;;  %v618_v1 = vor.u32 %v617_v57, %v530_v40  ;;  %v2900_v5 = vld [vmem:[#allocation9 + $0x98] sm:$0xff]   ;;  %v2901_v14 = vld [vmem:[#allocation9 + $0x70] sm:$0xff]   ;;  %v2903_v23 = vld [vmem:[#allocation9 + $0x68] sm:$0xff]   ;;  %s2393_s3 = sshll.u32 %s4274_s21, 4 }
  0xd9   : > { %v542_v2 = vor.u32 %v540_v47, %v539_v58  ;;  %v551_v3 = vshrl.u32 %v3575_v26, 16  ;;  %v554_v6 = vshll.u32 %v3575_v26, 16  ;;  %v620_v7 = vor.u32 %v619_v59, %v537_v45  ;;  %v2902_v17 = vld [vmem:[#allocation9 + $0x90] sm:$0xff]   ;;  %v2905_v40 = vld [vmem:[#allocation9 + $0x60] sm:$0xff]   ;;  %v2907_v50 = vld [vmem:[#allocation9 + $0xb8] sm:$0xff]   ;;  %s4276_s8 = sld [smem:[#allocation57_spill]] }
  0xda   : > { %2507 = vmatpush3.bf16.msra.mxu0 %v2881_v24  ;;  %2724 = vmatpush3.bf16.msra.mxu1 %v2881_v24  ;;  %v549_v8 = vor.u32 %v547_v52, %v546_v62  ;;  %v622_v9 = vor.u32 %v621_v63, %v544_v51  ;;  %v3630_v10 = vsel %vm3605_vm6, 0, %v535_v0  ;;  %v3634_v11 = vsel %vm3612_vm7, %v618_v1, 0  ;;  %v2908_v51 = vld [vmem:[#allocation9 + $0xd8] sm:$0xff]   ;;  %v2909_v63 = vld [vmem:[#allocation9 + $0xb0] sm:$0xff]   ;;  %v2911_v1 = vld [vmem:[#allocation9 + $0xa8] sm:$0xff]   ;;  %s2060_s1 = scalar_lea.sflag [#allocation5], %s3496_s23 }
  0xdb   : > { %2508 = vmatprep.subr.bf16.mxu0 %v2882_v27  ;;  %2721 = vmatprep.subr.bf16.mxu1 %v2882_v27  ;;  %v3638_v12 = vsel %vm3605_vm6, 0, %v542_v2  ;;  %v553_v13 = vrot.slane %v551_v3, 7  ;;  %v623_v15 = vrot.slane %v554_v6, 1  ;;  %v3642_v16 = vsel %vm3612_vm7, %v620_v7, 0  ;;  %v2910_v0 = vld [vmem:[#allocation9 + $0xd0] sm:$0xff]   ;;  %v2912_v2 = vld [vmem:[#allocation9 + $0xc8] sm:$0xff]  }
  0xdc   : > { %v3650_v18 = vsel %vm3605_vm6, 0, %v549_v8  ;;  %v3654_v19 = vsel %vm3612_vm7, %v622_v9, 0  ;;  %v558_v20 = vshrl.u32 %v3582_v33, 16  ;;  %v561_v21 = vshll.u32 %v3582_v33, 16  ;;  %v2917_v7 = vld [vmem:[#allocation9 + $0x118] sm:$0xff]   ;;  %s2382_s28 = sshll.u32 %s4275_s4, 5 }
  0xdd   : > { %v556_v22 = vor.u32 %v554_v6, %v553_v13  ;;  %v565_v24 = vshrl.u32 %v3586_v39, 16  ;;  %v624_v25 = vor.u32 %v623_v15, %v551_v3  ;;  %v568_v28 = vshll.u32 %v3586_v39, 16  ;;  %v2914_v3 = vld [vmem:[#allocation9 + $0xa0] sm:$0xff]   ;;  %v2916_v6 = vld [vmem:[#allocation9 + $0xf8] sm:$0xff]   ;;  %v2919_v15 = vld [vmem:[#allocation9 + $0x110] sm:$0xff]   ;;  %s2073_s26 = sadd.s32 %s2393_s3, %s2382_s28  ;;  %s3035_s30 = scalar_lea.vmem %s4064_s7, 2048 }
  0xde   : > { %2509 = vmatpush3.bf16.msra.mxu0 %v2882_v27  ;;  %2725 = vmatpush3.bf16.msra.mxu1 %v2882_v27  ;;  %v2904_v27 = vld [vmem:[#allocation9 + $0x88] sm:$0xff]   ;;  %v572_v38 = vshrl.u32 %v3601_v46, 16  ;;  %v575_v45 = vshll.u32 %v3601_v46, 16  ;;  %s2383_s2 = sshll.u32 %s2073_s26, 7  ;;  %p3036_p3 = scmp.ne.s32.totalorder %s4064_s7, %s3035_s30 }
  0xdf   : > { %2526 = vmatprep.subr.bf16.mxu1 %v2887_v29  ;;  %2550 = vmatprep.subr.bf16.mxu0 %v2888_v31  ;;  %v3666_v32 = vsel %vm3605_vm6, 0, %v556_v22  ;;  %v627_v36 = vrot.slane %v568_v28, 1  ;;  %s4062_s27 = scalar_lea.hbm %s4276_s8, %s2383_s2  ;;  %p4277_p8 = scmp.ne.s32.totalorder %s4203_s20, 0 }
  0xe0   : > { %v629_v56 = vrot.slane %v575_v45, 1  ;;  %s3201_s5 = smov [#allocation11]  }
  0xe1   : > { %2511 = vmatmul.mubr.msk.bf16.vlgmr.msra.gmra.mxu0 %vm699_vm1, %v3580_v30  ;;  %2519 = vmatmul.mubr.msk.bf16.vlgmr.msra.gmra.mxu1 %vm699_vm1, %v3582_v33  ;;  %v628_v48 = vor.u32 %v627_v36, %v565_v24  ;;  %p3037_p0 = pnand %p3036_p3, %p4277_p8  ;;  %s3039_s18 = sshll.u32 %s3201_s5, 4  ;;  %s3040_s18 = int_to_ptr.vmem [resolvable:$false] %s3039_s18 }
  0xe2   : > { %2527 = vmatpush3.bf16.msra.mxu1 %v2887_v29  ;;  %2551 = vmatpush3.bf16.msra.mxu0 %v2888_v31  ;;  %v560_v29 = vrot.slane %v558_v20, 7  ;;  %v625_v31 = vrot.slane %v561_v21, 1  ;;  %s3041_s19 = scalar_lea.vmem %s3040_s18, 4096  ;;  %p3042_p11 = scmp.lt.s32.totalorder %s4064_s7, %s3040_s18 }
  0xe3   : > { %2528 = vmatprep.subr.bf16.mxu1 %v2889_v34  ;;  %2552 = vmatprep.subr.bf16.mxu0 %v2890_v35  ;;  %v3696_v58 = vsel %vm3612_vm7, %v628_v48, 0  ;;  %p3038_p13 = pneg %p3037_p0  ;;  %p3043_p10 = scmp.lt.s32.totalorder %s3041_s19, %s3035_s30 }
  0xe4   : > { %2514 = vmatprep.mubr.msk.bf16.mxu0 %vm699_vm1, %v3584_v37  ;;  %2522 = vmatprep.mubr.msk.bf16.mxu1 %vm699_vm1, %v3586_v39  ;;  %v563_v43 = vor.u32 %v561_v21, %v560_v29  ;;  %v2924_v21 = vld [vmem:[#allocation9 + $0x100] sm:$0xff]  }
  0xe5   : > { %p3044_p6 = por %p3043_p10, %p3042_p11 }
  0xe6   : > { %2529 = vmatpush3.bf16.msra.mxu1 %v2889_v34  ;;  %2553 = vmatpush3.bf16.msra.mxu0 %v2890_v35  ;;  %v567_v34 = vrot.slane %v565_v24, 7  ;;  %v3670_v35 = vsel %vm3612_vm7, %v624_v25, 0  ;;  %v3684_v52 = vsel %vm3605_vm6, 0, %v563_v43 }
  0xe7   : > { %2530 = vmatprep.subr.bf16.mxu1 %v2895_v42  ;;  %2554 = vmatprep.subr.bf16.mxu0 %v2896_v44  ;;  %p3045_p9 = pnand %p3044_p6, %p3038_p13 }
  0xe8   : > { %v570_v47 = vor.u32 %v568_v28, %v567_v34 }
  0xe9   : > { %2515 = vmatmul.mubr.msk.bf16.gmra.mxu0 %vm699_vm1, %v3593_v41  ;;  %2523 = vmatmul.mubr.msk.bf16.gmra.mxu1 %vm699_vm1, %v3601_v46 }
  0xea   : > { %2531 = vmatpush3.bf16.msra.mxu1 %v2895_v42  ;;  %2555 = vmatpush3.bf16.msra.mxu0 %v2896_v44  ;;  %v2906_v42 = vld [vmem:[#allocation9 + $0x80] sm:$0xff]   ;;  %v626_v44 = vor.u32 %v625_v31, %v558_v20  ;;  %v3692_v57 = vsel %vm3605_vm6, 0, %v570_v47 }
  0xeb   : > { %2532 = vmatprep.subr.bf16.mxu1 %v2897_v53  ;;  %2556 = vmatprep.subr.bf16.mxu0 %v2898_v54  ;;  %v2923_v20 = vld [vmem:[#allocation9 + $0xe0] sm:$0xff]  }
  0xec   : > { %2534 = vmatprep.mubr.msk.bf16.mxu1 %vm699_vm1, %v605_v60  ;;  %2558 = vmatprep.mubr.msk.bf16.mxu0 %vm699_vm1, %v648_v61  ;;  %v630_v60 = vor.u32 %v629_v56, %v572_v38 }
  0xee   : > { %2533 = vmatpush3.bf16.msra.mxu1 %v2897_v53  ;;  %2557 = vmatpush3.bf16.msra.mxu0 %v2898_v54  ;;  %v574_v53 = vrot.slane %v572_v38, 7  ;;  %v3688_v54 = vsel %vm3612_vm7, %v626_v44, 0  ;;  %v3712_v62 = vsel %vm3612_vm7, %v630_v60, 0 }
  0xef   : > { %2574 = vmatprep.subr.bf16.mxu1 %v2899_v4  ;;  %2598 = vmatprep.subr.bf16.mxu0 %v2900_v5 }
  0xf0   : > { %v577_v59 = vor.u32 %v575_v45, %v574_v53 }
  0xf1   : > { %2535 = vmatmul.mubr.msk.bf16.vlgmr.msra.gmra.mxu1 %vm699_vm1, %v3630_v10  ;;  %2559 = vmatmul.mubr.msk.bf16.vlgmr.msra.gmra.mxu0 %vm699_vm1, %v3634_v11 }
  0xf2   : > { %2575 = vmatpush3.bf16.msra.mxu1 %v2899_v4  ;;  %2599 = vmatpush3.bf16.msra.mxu0 %v2900_v5  ;;  %v3708_v61 = vsel %vm3605_vm6, 0, %v577_v59  ;;  %v2915_v4 = vld [vmem:[#allocation9 + $0xc0] sm:$0xff]  }
  0xf3   : > { %2538 = vmatprep.mubr.msk.bf16.mxu1 %vm699_vm1, %v3638_v12  ;;  %2562 = vmatprep.mubr.msk.bf16.mxu0 %vm699_vm1, %v3642_v16 }
  0xf4   : > { %2576 = vmatprep.subr.bf16.mxu1 %v2901_v14  ;;  %2600 = vmatprep.subr.bf16.mxu0 %v2902_v17 }
  0xf6   : > { %2577 = vmatpush3.bf16.msra.mxu1 %v2901_v14  ;;  %2601 = vmatpush3.bf16.msra.mxu0 %v2902_v17  ;;  %v2918_v14 = vld [vmem:[#allocation9 + $0xf0] sm:$0xff]   ;;  %v2921_v17 = vld [vmem:[#allocation9 + $0x108] sm:$0xff]  }
  0xf7   : > { %2578 = vmatprep.subr.bf16.mxu1 %v2903_v23  ;;  %2602 = vmatprep.subr.bf16.mxu0 %v2904_v27 }
  0xf9   : > { %2539 = vmatmul.mubr.msk.bf16.gmra.mxu1 %vm699_vm1, %v3650_v18  ;;  %2563 = vmatmul.mubr.msk.bf16.gmra.mxu0 %vm699_vm1, %v3654_v19 }
  0xfa   : > { %2542 = vmatprep.mubr.msk.bf16.mxu1 %vm699_vm1, %v3666_v32  ;;  %2566 = vmatprep.mubr.msk.bf16.mxu0 %vm699_vm1, %v3670_v35 }
  0xfb   : > { %2579 = vmatpush3.bf16.msra.mxu1 %v2903_v23  ;;  %2603 = vmatpush3.bf16.msra.mxu0 %v2904_v27 }
  0xfc   : > { %2580 = vmatprep.subr.bf16.mxu1 %v2905_v40  ;;  %2604 = vmatprep.subr.bf16.mxu0 %v2906_v42 }
  0xff   : > { %2581 = vmatpush3.bf16.msra.mxu1 %v2905_v40  ;;  %2605 = vmatpush3.bf16.msra.mxu0 %v2906_v42 }
 0x100   : > { %2622 = vmatprep.subr.bf16.mxu1 %v2907_v50  ;;  %2646 = vmatprep.subr.bf16.mxu0 %v2908_v51 }
 0x101   : > { %2543 = vmatmul.mubr.msk.bf16.gmra.mxu1 %vm699_vm1, %v3684_v52  ;;  %2567 = vmatmul.mubr.msk.bf16.gmra.mxu0 %vm699_vm1, %v3688_v54 }
 0x102   : > { %2546 = vmatprep.mubr.msk.bf16.mxu1 %vm699_vm1, %v3692_v57  ;;  %2570 = vmatprep.mubr.msk.bf16.mxu0 %vm699_vm1, %v3696_v58 }
 0x109   : > { %2547 = vmatmul.mubr.msk.bf16.gmra.mxu1 %vm699_vm1, %v3708_v61  ;;  %2571 = vmatmul.mubr.msk.bf16.gmra.mxu0 %vm699_vm1, %v3712_v62 }
 0x10a   : > { %2582 = vmatprep.mubr.msk.bf16.mxu1 %vm699_vm1, %v3630_v10  ;;  %2606 = vmatprep.mubr.msk.bf16.mxu0 %vm699_vm1, %v3580_v30  ;;  %v3730_v30 = vld [vmem:[#allocation2 + $0x40] sm:$0xff]  }
 0x10b   : > { %v579_v5 = vshrl.u32 %v3730_v30, 16  ;;  %v582_v9 = vshll.u32 %v3730_v30, 16 }
 0x10d   : > { %v581_v8 = vrot.slane %v579_v5, 7  ;;  %v631_v22 = vrot.slane %v582_v9, 1 }
 0x10f   : > { %v584_v10 = vor.u32 %v582_v9, %v581_v8  ;;  %v632_v25 = vor.u32 %v631_v22, %v579_v5 }
 0x111   : > { %2583 = vmatmul.mubr.msk.bf16.vlgmr.msra.gmra.mxu1 %vm699_vm1, %v3638_v12  ;;  %2607 = vmatmul.mubr.msk.bf16.vlgmr.msra.gmra.mxu0 %vm699_vm1, %v3584_v37  ;;  %v613_v13 = vsel %vm3605_vm6, 0, %v584_v10  ;;  %v656_v28 = vsel %vm3612_vm7, %v632_v25, 0 }
 0x112   : > { %2623 = vmatpush3.bf16.msra.mxu1 %v2907_v50  ;;  %2647 = vmatpush3.bf16.msra.mxu0 %v2908_v51 }
 0x113   : > { %2586 = vmatprep.mubr.msk.bf16.mxu1 %vm699_vm1, %v3650_v18  ;;  %2610 = vmatprep.mubr.msk.bf16.mxu0 %vm699_vm1, %v3593_v41 }
 0x114   : > { %2624 = vmatprep.subr.bf16.mxu1 %v2909_v63  ;;  %2648 = vmatprep.subr.bf16.mxu0 %v2910_v0 }
 0x116   : > { %2625 = vmatpush3.bf16.msra.mxu1 %v2909_v63  ;;  %2649 = vmatpush3.bf16.msra.mxu0 %v2910_v0 }
 0x117   : > { %2626 = vmatprep.subr.bf16.mxu1 %v2911_v1  ;;  %2650 = vmatprep.subr.bf16.mxu0 %v2912_v2 }
 0x119   : > { %2587 = vmatmul.mubr.msk.bf16.gmra.mxu1 %vm699_vm1, %v3666_v32  ;;  %2611 = vmatmul.mubr.msk.bf16.gmra.mxu0 %vm699_vm1, %v3575_v26 }
 0x11a   : > { %2590 = vmatprep.mubr.msk.bf16.mxu1 %vm699_vm1, %v3684_v52  ;;  %2614 = vmatprep.mubr.msk.bf16.mxu0 %vm699_vm1, %v3582_v33 }
 0x11b   : > { %2627 = vmatpush3.bf16.msra.mxu1 %v2911_v1  ;;  %2651 = vmatpush3.bf16.msra.mxu0 %v2912_v2 }
 0x11c   : > { %2628 = vmatprep.subr.bf16.mxu1 %v2914_v3  ;;  %2652 = vmatprep.subr.bf16.mxu0 %v2915_v4 }
 0x11f   : > { %2629 = vmatpush3.bf16.msra.mxu1 %v2914_v3  ;;  %2653 = vmatpush3.bf16.msra.mxu0 %v2915_v4 }
 0x120   : > { %2670 = vmatprep.subr.bf16.mxu1 %v2916_v6  ;;  %2694 = vmatprep.subr.bf16.mxu0 %v2917_v7 }
 0x121   : > { %2591 = vmatmul.mubr.msk.bf16.gmra.mxu1 %vm699_vm1, %v3692_v57  ;;  %2615 = vmatmul.mubr.msk.bf16.gmra.mxu0 %vm699_vm1, %v3586_v39 }
 0x122   : > { %2594 = vmatprep.mubr.msk.bf16.mxu1 %vm699_vm1, %v3708_v61  ;;  %2618 = vmatprep.mubr.msk.bf16.mxu0 %vm699_vm1, %v3601_v46 }
 0x129   : > { %2595 = vmatmul.mubr.msk.bf16.gmra.mxu1 %vm699_vm1, %v613_v13  ;;  %2619 = vmatmul.mubr.msk.bf16.gmra.mxu0 %vm699_vm1, %v3730_v30 }
 0x12a   : > { %2630 = vmatprep.mubr.msk.bf16.mxu1 %vm699_vm1, %v3634_v11  ;;  %2654 = vmatprep.mubr.msk.bf16.mxu0 %vm699_vm1, %v3638_v12  ;;  %v2920_v11 = vld [vmem:[#allocation9 + $0xe8] sm:$0xff]   ;;  %v2922_v12 = vld [vmem:[#allocation2 + $0x48] sm:$0xff]  }
 0x12b   : > { %v589_v24 = vshll.u32 %v2922_v12, 16 }
 0x131   : > { %2631 = vmatmul.mubr.msk.bf16.vlgmr.msra.gmra.mxu1 %vm699_vm1, %v3642_v16  ;;  %2655 = vmatmul.mubr.msk.bf16.vlgmr.msra.gmra.mxu0 %vm699_vm1, %v3650_v18  ;;  %v586_v18 = vshrl.u32 %v2922_v12, 16 }
 0x132   : > { %2671 = vmatpush3.bf16.msra.mxu1 %v2916_v6  ;;  %2695 = vmatpush3.bf16.msra.mxu0 %v2917_v7 }
 0x133   : > { %2634 = vmatprep.mubr.msk.bf16.mxu1 %vm699_vm1, %v3654_v19  ;;  %2658 = vmatprep.mubr.msk.bf16.mxu0 %vm699_vm1, %v3666_v32  ;;  %v588_v23 = vrot.slane %v586_v18, 7 }
 0x134   : > { %2672 = vmatprep.subr.bf16.mxu1 %v2918_v14  ;;  %2696 = vmatprep.subr.bf16.mxu0 %v2919_v15 }
 0x135   : > { %v591_v27 = vor.u32 %v589_v24, %v588_v23 }
 0x136   : > { %2673 = vmatpush3.bf16.msra.mxu1 %v2918_v14  ;;  %2697 = vmatpush3.bf16.msra.mxu0 %v2919_v15 }
 0x137   : > { %2674 = vmatprep.subr.bf16.mxu1 %v2920_v11  ;;  %2698 = vmatprep.subr.bf16.mxu0 %v2921_v17  ;;  %v614_v29 = vsel %vm3605_vm6, 0, %v591_v27 }
 0x139   : > { %2635 = vmatmul.mubr.msk.bf16.gmra.mxu1 %vm699_vm1, %v3670_v35  ;;  %2659 = vmatmul.mubr.msk.bf16.gmra.mxu0 %vm699_vm1, %v3684_v52 }
 0x13a   : > { %2638 = vmatprep.mubr.msk.bf16.mxu1 %vm699_vm1, %v3688_v54  ;;  %2662 = vmatprep.mubr.msk.bf16.mxu0 %vm699_vm1, %v3692_v57 }
 0x13b   : > { %2675 = vmatpush3.bf16.msra.mxu1 %v2920_v11  ;;  %2699 = vmatpush3.bf16.msra.mxu0 %v2921_v17 }
 0x13c   : > { %2676 = vmatprep.subr.bf16.mxu1 %v2923_v20  ;;  %2700 = vmatprep.subr.bf16.mxu0 %v2924_v21 }
 0x13f   : > { %2677 = vmatpush3.bf16.msra.mxu1 %v2923_v20  ;;  %2701 = vmatpush3.bf16.msra.mxu0 %v2924_v21 }
 0x141   : > { %2639 = vmatmul.mubr.msk.bf16.gmra.mxu1 %vm699_vm1, %v3696_v58  ;;  %2663 = vmatmul.mubr.msk.bf16.gmra.mxu0 %vm699_vm1, %v3708_v61 }
 0x142   : > { %2642 = vmatprep.mubr.msk.bf16.mxu1 %vm699_vm1, %v3712_v62  ;;  %2666 = vmatprep.mubr.msk.bf16.mxu0 %vm699_vm1, %v613_v13 }
 0x149   : > { %2643 = vmatmul.mubr.msk.bf16.gmra.mxu1 %vm699_vm1, %v656_v28  ;;  %2667 = vmatmul.mubr.msk.bf16.gmra.mxu0 %vm699_vm1, %v614_v29 }
 0x14a   : > { %2678 = vmatprep.mubr.msk.bf16.mxu1 %vm699_vm1, %v3584_v37  ;;  %2702 = vmatprep.mubr.msk.bf16.mxu0 %vm699_vm1, %v3642_v16  ;;  %v633_v37 = vrot.slane %v589_v24, 1 }
 0x151   : > { %2679 = vmatmul.mubr.msk.bf16.vlgmr.msra.gmra.mxu1 %vm699_vm1, %v3593_v41  ;;  %2703 = vmatmul.mubr.msk.bf16.vlgmr.msra.gmra.mxu0 %vm699_vm1, %v3654_v19 }
 0x152   : > { %2682 = vmatprep.mubr.msk.bf16.mxu1 %vm699_vm1, %v3575_v26  ;;  %2706 = vmatprep.mubr.msk.bf16.mxu0 %vm699_vm1, %v3670_v35  ;;  %v634_v26 = vor.u32 %v633_v37, %v586_v18 }
 0x159   : > { %2683 = vmatmul.mubr.msk.bf16.gmra.mxu1 %vm699_vm1, %v3582_v33  ;;  %2707 = vmatmul.mubr.msk.bf16.gmra.mxu0 %vm699_vm1, %v3688_v54  ;;  %v657_v33 = vsel %vm3612_vm7, %v634_v26, 0 }
 0x15a   : > { %2686 = vmatprep.mubr.msk.bf16.mxu1 %vm699_vm1, %v3586_v39  ;;  %2710 = vmatprep.mubr.msk.bf16.mxu0 %vm699_vm1, %v3696_v58 }
 0x161   : > { %2687 = vmatmul.mubr.msk.bf16.gmra.mxu1 %vm699_vm1, %v3601_v46  ;;  %2711 = vmatmul.mubr.msk.bf16.gmra.mxu0 %vm699_vm1, %v3712_v62 }
 0x162   : > { %2690 = vmatprep.mubr.msk.bf16.mxu1 %vm699_vm1, %v3730_v30  ;;  %2714 = vmatprep.mubr.msk.bf16.mxu0 %vm699_vm1, %v656_v28 }
 0x169   : > { %2691 = vmatmul.mubr.msk.bf16.gmra.mxu1 %vm699_vm1, %v2922_v12  ;;  %2715 = vmatmul.mubr.msk.bf16.gmra.mxu0 %vm699_vm1, %v657_v33 }
 0x1a1   : > { %v2512_v39 = vpop.f32.mrf.mxu0  ;;  %v2520_v41 = vpop.f32.mrf.mxu1 }
 0x1a3   : > { %v750_v49 = vpop.f32.mrf.mxu0  ;;  %v782_v46 = vpop.f32.mrf.mxu1 }
 0x1a5   : > { %v2513_v16 = vpop.f32.mrf.mxu0  ;;  %v2521_v19 = vpop.f32.mrf.mxu1 }
 0x1a7   : > { %v753_v31 = vpop.f32.mrf.mxu0  ;;  %v785_v32 = vpop.f32.mrf.mxu1 }
 0x1a9   : > { %v2516_v34 = vpop.f32.mrf.mxu0  ;;  %v2524_v35 = vpop.f32.mrf.mxu1 }
 0x1ab   : > { %v766_v36 = vpop.f32.mrf.mxu0  ;;  %v798_v38 = vpop.f32.mrf.mxu1 }
 0x1ad   : > { %v2517_v40 = vpop.f32.mrf.mxu0  ;;  %v2525_v42 = vpop.f32.mrf.mxu1 }
 0x1af   : > { %v769_v55 = vpop.f32.mrf.mxu0  ;;  %v3819_v43 = vpop.f32.mrf.mxu1 }
 0x1b1   : > { %v2536_v44 = vpop.f32.mrf.mxu1  ;;  %v2560_v45 = vpop.f32.mrf.mxu0 }
 0x1b2   : > { %v904_v47 = vadd.f32 %v2536_v44, %v2512_v39 }
 0x1b3   : > { %v895_v48 = vpop.f32.mrf.mxu1  ;;  %v1049_v50 = vpop.f32.mrf.mxu0 }
 0x1b4   : > { %v3821_v51 = vadd.f32 %v2560_v45, %v904_v47  ;;  %v896_v52 = vadd.f32 %v895_v48, %v750_v49 }
 0x1b5   : > { %v2537_v53 = vpop.f32.mrf.mxu1  ;;  %v2561_v54 = vpop.f32.mrf.mxu0 }
 0x1b6   : > { %v3823_v56 = vadd.f32 %v1049_v50, %v896_v52  ;;  %v907_v57 = vadd.f32 %v2537_v53, %v2513_v16 }
 0x1b7   : > { %v898_v58 = vpop.f32.mrf.mxu1  ;;  %v1052_v59 = vpop.f32.mrf.mxu0 }
 0x1b8   : > { %v3825_v60 = vadd.f32 %v2561_v54, %v907_v57  ;;  %v899_v61 = vadd.f32 %v898_v58, %v753_v31 }
 0x1b9   : > { %v2540_v62 = vpop.f32.mrf.mxu1  ;;  %v2564_v63 = vpop.f32.mrf.mxu0 }
 0x1ba   : > { %v3827_v0 = vadd.f32 %v1052_v59, %v899_v61  ;;  %v920_v1 = vadd.f32 %v2540_v62, %v2516_v34 }
 0x1bb   : > { %v911_v2 = vpop.f32.mrf.mxu1  ;;  %v1065_v30 = vpop.f32.mrf.mxu0 }
 0x1bc   : > { %v3829_v3 = vadd.f32 %v2564_v63, %v920_v1  ;;  %v912_v4 = vadd.f32 %v911_v2, %v766_v36 }
 0x1bd   : > { %v2541_v5 = vpop.f32.mrf.mxu1  ;;  %v2565_v6 = vpop.f32.mrf.mxu0 }
 0x1be   : > { %v3831_v7 = vadd.f32 %v1065_v30, %v912_v4  ;;  %v923_v8 = vadd.f32 %v2541_v5, %v2517_v40 }
 0x1bf   : > { %v914_v9 = vpop.f32.mrf.mxu1  ;;  %v1068_v10 = vpop.f32.mrf.mxu0 }
 0x1c0   : > { %v3833_v13 = vadd.f32 %v2565_v6, %v923_v8  ;;  %v915_v14 = vadd.f32 %v914_v9, %v769_v55 }
 0x1c1   : > { %v2544_v15 = vpop.f32.mrf.mxu1  ;;  %v2568_v11 = vpop.f32.mrf.mxu0 }
 0x1c2   : > { %v3835_v17 = vadd.f32 %v1068_v10, %v915_v14  ;;  %v936_v12 = vadd.f32 %v2544_v15, %v2520_v41 }
 0x1c3   : > { %v927_v20 = vpop.f32.mrf.mxu1  ;;  %v1081_v21 = vpop.f32.mrf.mxu0 }
 0x1c4   : > { %v3837_v18 = vadd.f32 %v2568_v11, %v936_v12  ;;  %v928_v22 = vadd.f32 %v927_v20, %v782_v46 }
 0x1c5   : > { %v2545_v23 = vpop.f32.mrf.mxu1  ;;  %v2569_v24 = vpop.f32.mrf.mxu0 }
 0x1c6   : > { %v3839_v25 = vadd.f32 %v1081_v21, %v928_v22  ;;  %v939_v27 = vadd.f32 %v2545_v23, %v2521_v19 }
 0x1c7   : > { %v930_v28 = vpop.f32.mrf.mxu1  ;;  %v1084_v29 = vpop.f32.mrf.mxu0 }
 0x1c8   : > { %v3841_v37 = vadd.f32 %v2569_v24, %v939_v27  ;;  %v931_v26 = vadd.f32 %v930_v28, %v785_v32 }
 0x1c9   : > { %v2548_v33 = vpop.f32.mrf.mxu1  ;;  %v2572_v39 = vpop.f32.mrf.mxu0 }
 0x1ca   : > { %v3843_v49 = vadd.f32 %v1084_v29, %v931_v26  ;;  %v952_v41 = vadd.f32 %v2548_v33, %v2524_v35 }
 0x1cb   : > { %v943_v16 = vpop.f32.mrf.mxu1  ;;  %v1097_v31 = vpop.f32.mrf.mxu0 }
 0x1cc   : > { %v3845_v34 = vadd.f32 %v2572_v39, %v952_v41  ;;  %v944_v46 = vadd.f32 %v943_v16, %v798_v38 }
 0x1cd   : > { %v2549_v36 = vpop.f32.mrf.mxu1  ;;  %v2573_v40 = vpop.f32.mrf.mxu0 }
 0x1ce   : > { %v3847_v55 = vadd.f32 %v1097_v31, %v944_v46  ;;  %v955_v19 = vadd.f32 %v2549_v36, %v2525_v42 }
 0x1cf   : > { %v946_v44 = vpop.f32.mrf.mxu1  ;;  %v1100_v45 = vpop.f32.mrf.mxu0 }
 0x1d0   : > { %4233 = vst [vmem:[#allocation32_spill] sm:$0xff] %v3847_v55  ;;  %v3849_v47 = vadd.f32 %v2573_v40, %v955_v19  ;;  %v947_v32 = vadd.f32 %v946_v44, %v3819_v43 }
 0x1d1   : > { %v2584_v48 = vpop.f32.mrf.mxu1  ;;  %v2608_v50 = vpop.f32.mrf.mxu0 }
 0x1d2   : > { %4234 = vst [vmem:[#allocation33_spill] sm:$0xff] %v3849_v47  ;;  %v3852_v52 = vadd.f32 %v1100_v45, %v947_v32  ;;  %v1263_v47 = vadd.f32 %v2584_v48, %v3821_v51 }
 0x1d3   : > { %v1198_v35 = vpop.f32.mrf.mxu1  ;;  %v1346_v53 = vpop.f32.mrf.mxu0 }
 0x1d4   : > { %4235 = vst [vmem:[#allocation34_spill] sm:$0xff] %v3852_v52  ;;  %v1261_v55 = vadd.f32 %v1198_v35, %v3823_v56 }
 0x1d5   : > { %v2585_v54 = vpop.f32.mrf.mxu1  ;;  %v3854_v57 = vpop.f32.mrf.mxu0 }
 0x1d7   : > { %v1201_v38 = vpop.f32.mrf.mxu1  ;;  %v3856_v58 = vpop.f32.mrf.mxu0 }
 0x1d8   : > { %v1262_v51 = vadd.f32 %v1201_v38, %v3827_v0 }
 0x1d9   : > { %v2588_v59 = vpop.f32.mrf.mxu1  ;;  %v3858_v42 = vpop.f32.mrf.mxu0 }
 0x1db   : > { %v1214_v61 = vpop.f32.mrf.mxu1  ;;  %v3860_v62 = vpop.f32.mrf.mxu0 }
 0x1dd   : > { %v3862_v63 = vpop.f32.mrf.mxu1  ;;  %v3864_v43 = vpop.f32.mrf.mxu0 }
 0x1df   : > { %v3866_v1 = vpop.f32.mrf.mxu1  ;;  %v3868_v2 = vpop.f32.mrf.mxu0 }
 0x1e1   : > { %v3870_v30 = vpop.f32.mrf.mxu1  ;;  %v3872_v4 = vpop.f32.mrf.mxu0 }
 0x1e3   : > { %v3874_v5 = vpop.f32.mrf.mxu1  ;;  %v3876_v6 = vpop.f32.mrf.mxu0 }
 0x1e5   : > { %v3878_v8 = vpop.f32.mrf.mxu1  ;;  %v3880_v9 = vpop.f32.mrf.mxu0 }
 0x1e7   : > { %v3882_v10 = vpop.f32.mrf.mxu1  ;;  %v3884_v14 = vpop.f32.mrf.mxu0 }
 0x1e8   : > { %4236 = vst [vmem:[#allocation35_spill] sm:$0xff] %v3884_v14 }
 0x1e9   : > { %v3886_v15 = vpop.f32.mrf.mxu1  ;;  %v3888_v11 = vpop.f32.mrf.mxu0 }
 0x1ea   : > { %4237 = vst [vmem:[#allocation36_spill] sm:$0xff] %v3888_v11 }
 0x1eb   : > { %v3890_v12 = vpop.f32.mrf.mxu1  ;;  %v3892_v20 = vpop.f32.mrf.mxu0 }
 0x1ec   : > { %4238 = vst [vmem:[#allocation37_spill] sm:$0xff] %v3890_v12  ;;  %4239 = vst [vmem:[#allocation38_spill] sm:$0xff] %v3892_v20 }
 0x1ed   : > { %v3894_v21 = vpop.f32.mrf.mxu1  ;;  %v3896_v22 = vpop.f32.mrf.mxu0 }
 0x1ee   : > { %4240 = vst [vmem:[#allocation39_spill] sm:$0xff] %v3894_v21  ;;  %4241 = vst [vmem:[#allocation40_spill] sm:$0xff] %v3896_v22 }
 0x1ef   : > { %v3898_v23 = vpop.f32.mrf.mxu1  ;;  %v3900_v24 = vpop.f32.mrf.mxu0 }
 0x1f0   : > { %4242 = vst [vmem:[#allocation41_spill] sm:$0xff] %v3898_v23  ;;  %4243 = vst [vmem:[#allocation42_spill] sm:$0xff] %v3900_v24 }
 0x1f1   : > { %v2632_v27 = vpop.f32.mrf.mxu1  ;;  %v2656_v28 = vpop.f32.mrf.mxu0 }
 0x1f3   : > { %v1495_v29 = vpop.f32.mrf.mxu1  ;;  %v1644_v26 = vpop.f32.mrf.mxu0 }
 0x1f5   : > { %v2633_v33 = vpop.f32.mrf.mxu1  ;;  %v2657_v39 = vpop.f32.mrf.mxu0 }
 0x1f7   : > { %v1498_v41 = vpop.f32.mrf.mxu1  ;;  %v1647_v16 = vpop.f32.mrf.mxu0 }
 0x1f9   : > { %v2636_v31 = vpop.f32.mrf.mxu1  ;;  %v3902_v46 = vpop.f32.mrf.mxu0 }
 0x1fb   : > { %v1511_v36 = vpop.f32.mrf.mxu1  ;;  %v3904_v40 = vpop.f32.mrf.mxu0 }
 0x1fd   : > { %v3906_v19 = vpop.f32.mrf.mxu1  ;;  %v3908_v44 = vpop.f32.mrf.mxu0 }
 0x1ff   : > { %v3910_v45 = vpop.f32.mrf.mxu1  ;;  %v3912_v32 = vpop.f32.mrf.mxu0 }
 0x200   : > { %4244 = vst [vmem:[#allocation43_spill] sm:$0xff] %v3912_v32 }
 0x201   : > { %v3914_v24 = vpop.f32.mrf.mxu1  ;;  %v3916_v22 = vpop.f32.mrf.mxu0 }
 0x202   : > { %4245 = vst [vmem:[#allocation44_spill] sm:$0xff] %v3916_v22  ;;  %v1411_v22 = vadd.f32 %v2608_v50, %v1263_v47  ;;  %v1265_v47 = vadd.f32 %v1214_v61, %v3831_v7  ;;  %v1266_v61 = vadd.f32 %v3866_v1, %v3835_v17 }
 0x203   : > { %v3918_v23 = vpop.f32.mrf.mxu1  ;;  %v3920_v52 = vpop.f32.mrf.mxu0 }
 0x204   : > { %4246 = vst [vmem:[#allocation45_spill] sm:$0xff] %v3918_v23  ;;  %4247 = vst [vmem:[#allocation46_spill] sm:$0xff] %v3920_v52  ;;  %v1264_v23 = vadd.f32 %v2585_v54, %v3825_v60  ;;  %v1560_v48 = vadd.f32 %v2632_v27, %v1411_v22  ;;  %v1413_v7 = vadd.f32 %v3860_v62, %v1265_v47 }
 0x205   : > { %v3922_v20 = vpop.f32.mrf.mxu1  ;;  %v3924_v21 = vpop.f32.mrf.mxu0  ;;  %v1271_v62 = vadd.f32 %v3870_v30, %v3837_v18 }
 0x206   : > { %4248 = vst [vmem:[#allocation47_spill] sm:$0xff] %v3922_v20  ;;  %4249 = vst [vmem:[#allocation48_spill] sm:$0xff] %v3924_v21  ;;  %v1409_v21 = vadd.f32 %v1346_v53, %v1261_v55  ;;  %v1412_v35 = vadd.f32 %v3854_v57, %v1264_v23  ;;  %v1410_v55 = vadd.f32 %v3856_v58, %v1262_v51  ;;  %v3963_v58 = vld [vmem:[%s4253_s0] ss:$0 sm:$0xff] }
 0x207   : > { %v3927_v11 = vpop.f32.mrf.mxu1  ;;  %v3929_v12 = vpop.f32.mrf.mxu0  ;;  %v1709_v53 = vadd.f32 %v2656_v28, %v1560_v48 }
 0x208   : > { %4250 = vst [vmem:[#allocation49_spill] sm:$0xff] %v3927_v11  ;;  %4251 = vst [vmem:[#allocation50_spill] sm:$0xff] %v3929_v12  ;;  %v1267_v11 = vadd.f32 %v2588_v59, %v3829_v3  ;;  %v1561_v0 = vadd.f32 %v2633_v33, %v1412_v35  ;;  %v1268_v3 = vadd.f32 %v3862_v63, %v3833_v13 }
 0x209   : > { %v3932_v14 = vpop.f32.mrf.mxu1  ;;  %v3934_v32 = vpop.f32.mrf.mxu0  ;;  %v1559_v57 = vadd.f32 %v1498_v41, %v1410_v55  ;;  %v1419_v35 = vadd.f32 %v3872_v4, %v1271_v62  ;;  %v1270_v4 = vadd.f32 %v3882_v10, %v3843_v49 }
 0x20a   : > { %4252 = vst [vmem:[#allocation51_spill] sm:$0xff] %v3934_v32  ;;  %v1558_v32 = vadd.f32 %v1495_v29, %v1409_v21  ;;  %v1415_v54 = vadd.f32 %v3858_v42, %v1267_v11  ;;  %v1710_v27 = vadd.f32 %v2657_v39, %v1561_v0  ;;  %v1416_v28 = vadd.f32 %v3864_v43, %v1268_v3 }
 0x20b   : > { %v3937_v52 = vpop.f32.mrf.mxu1  ;;  %v3939_v20 = vpop.f32.mrf.mxu0  ;;  %v1562_v29 = vadd.f32 %v1511_v36, %v1413_v7  ;;  %v1708_v1 = vadd.f32 %v1647_v16, %v1559_v57  ;;  %v1269_v39 = vadd.f32 %v3874_v5, %v3839_v25  ;;  %v4255_v57 = vld [vmem:[#allocation43_spill] sm:$0xff] }
 0x20c   : > { %v1707_v22 = vadd.f32 %v1644_v26, %v1558_v32  ;;  %v1564_v23 = vadd.f32 %v2636_v31, %v1415_v54  ;;  %v1414_v32 = vadd.f32 %v3868_v2, %v1266_v61  ;;  %v1565_v18 = vadd.f32 %v3906_v19, %v1416_v28 }
 0x20d   : > { %v3943_v12 = vpop.f32.mrf.mxu1  ;;  %v3945_v56 = vpop.f32.mrf.mxu0  ;;  %v1272_v2 = vadd.f32 %v3878_v8, %v3841_v37  ;;  %v1711_v25 = vadd.f32 %v3904_v40, %v1562_v29  ;;  %v1417_v0 = vadd.f32 %v3876_v6, %v1269_v39  ;;  %v1568_v37 = vadd.f32 %v3914_v24, %v1419_v35  ;;  %v4260_v28 = vld [vmem:[#allocation47_spill] sm:$0xff]  ;;  %v4264_v39 = vld [vmem:[#allocation46_spill] sm:$0xff] }
 0x20e   : > { %v1713_v51 = vadd.f32 %v3902_v46, %v1564_v23  ;;  %v1563_v47 = vadd.f32 %v3910_v45, %v1414_v32  ;;  %v1714_v54 = vadd.f32 %v3908_v44, %v1565_v18  ;;  %v1275_v6 = vadd.f32 %v3886_v15, %v3845_v34  ;;  %v4256_v23 = vld [vmem:[#allocation35_spill] sm:$0xff] }
 0x20f   : > { %v3949_v60 = vpop.f32.mrf.mxu1  ;;  %v3951_v50 = vpop.f32.mrf.mxu0  ;;  %v4265_v18 = vld [vmem:[#allocation49_spill] sm:$0xff] }
 0x211   : > { %v2680_v38 = vpop.f32.mrf.mxu1  ;;  %v2704_v59 = vpop.f32.mrf.mxu0 }
 0x212   : > { %v1857_v21 = vadd.f32 %v2680_v38, %v1709_v53 }
 0x213   : > { %v1792_v42 = vpop.f32.mrf.mxu1  ;;  %v1941_v11 = vpop.f32.mrf.mxu0 }
 0x214   : > { %v2006_v13 = vadd.f32 %v2704_v59, %v1857_v21  ;;  %v1855_v63 = vadd.f32 %v1792_v42, %v1707_v22  ;;  %v1420_v59 = vadd.f32 %v3880_v9, %v1272_v2  ;;  %v4254_v22 = vld [vmem:[#allocation45_spill] sm:$0xff]  ;;  %v1712_v21 = vadd.f32 %v4255_v57, %v1563_v47  ;;  %v4266_v2 = vld [vmem:[#allocation38_spill] sm:$0xff] }
 0x215   : > { %v2681_v26 = vpop.f32.mrf.mxu1  ;;  %v2705_v17 = vpop.f32.mrf.mxu0  ;;  %v1566_v49 = vadd.f32 %v4254_v22, %v1417_v0  ;;  %v1418_v42 = vadd.f32 %v4256_v23, %v1270_v4  ;;  %v4258_v9 = vld [vmem:[#allocation37_spill] sm:$0xff]  ;;  %v4269_v0 = vld [vmem:[#allocation48_spill] sm:$0xff] }
 0x216   : > { %v2029_v33 = vadd.f32 %v3963_v58, %v2006_v13  ;;  %v2004_v41 = vadd.f32 %v1941_v11, %v1855_v63  ;;  %v1858_v31 = vadd.f32 %v2681_v26, %v1710_v27  ;;  %v4257_v11 = vld [vmem:[#allocation32_spill] sm:$0xff]  ;;  %v1569_v62 = vadd.f32 %v4260_v28, %v1420_v59 }
 0x217   : > { %v1795_v43 = vpop.f32.mrf.mxu1  ;;  %v1944_v48 = vpop.f32.mrf.mxu0  ;;  %v1273_v27 = vadd.f32 %v4258_v9, %v4257_v11  ;;  %v4259_v13 = vld [vmem:[#allocation44_spill] sm:$0xff] }
 0x218   : > { %2045 = vst.msk [vmem:[%s3567_s29 + $0x10] sm:$0xff] %vm699_vm1, %v2029_v33  ;;  %v2027_v30 = vadd.f32 %v3963_v58, %v2004_v41  ;;  %v2007_v16 = vadd.f32 %v2705_v17, %v1858_v31  ;;  %v1856_v36 = vadd.f32 %v1795_v43, %v1708_v1  ;;  %v1717_v34 = vadd.f32 %v4259_v13, %v1568_v37  ;;  %v4261_v1 = vld [vmem:[#allocation36_spill] sm:$0xff]  ;;  %v4262_v41 = vld [vmem:[#allocation33_spill] sm:$0xff]  ;;  %v4263_v31 = vld [vmem:[#allocation39_spill] sm:$0xff] }
 0x219   : > { %v2684_v5 = vpop.f32.mrf.mxu1  ;;  %v2708_v46 = vpop.f32.mrf.mxu0  ;;  %v1423_v33 = vadd.f32 %v4261_v1, %v1275_v6  ;;  %v1276_v32 = vadd.f32 %v4263_v31, %v4262_v41  ;;  %v1718_v4 = vadd.f32 %v4269_v0, %v1569_v62  ;;  %v4271_v6 = vld [vmem:[#allocation50_spill] sm:$0xff] }
 0x21a   : > { %2043 = vst.msk [vmem:[%s3567_s29] sm:$0xff] %vm699_vm1, %v2027_v30  ;;  %v2030_v19 = vadd.f32 %v3963_v58, %v2007_v16  ;;  %v2005_v55 = vadd.f32 %v1944_v48, %v1856_v36  ;;  %v1861_v53 = vadd.f32 %v2684_v5, %v1713_v51  ;;  %v1715_v51 = vadd.f32 %v4264_v39, %v1566_v49  ;;  %v4267_v5 = vld [vmem:[#allocation34_spill] sm:$0xff] }
 0x21b   : > { %v1808_v8 = vpop.f32.mrf.mxu1  ;;  %v1957_v40 = vpop.f32.mrf.mxu0  ;;  %v1567_v30 = vadd.f32 %v4265_v18, %v1418_v42 }
 0x21c   : > { %2046 = vst.msk [vmem:[%s3567_s29 + $0x18] sm:$0xff] %vm699_vm1, %v2030_v19  ;;  %v2028_v45 = vadd.f32 %v3963_v58, %v2005_v55  ;;  %v2010_v3 = vadd.f32 %v2708_v46, %v1861_v53  ;;  %v1859_v38 = vadd.f32 %v1808_v8, %v1711_v25  ;;  %v1421_v25 = vadd.f32 %v4266_v2, %v1273_v27  ;;  %v4268_v46 = vld [vmem:[#allocation41_spill] sm:$0xff] }
 0x21d   : > { %v2685_v10 = vpop.f32.mrf.mxu1  ;;  %v2709_v24 = vpop.f32.mrf.mxu0  ;;  %v1274_v47 = vadd.f32 %v4268_v46, %v4267_v5  ;;  %v1572_v19 = vadd.f32 %v3932_v14, %v1423_v33  ;;  %v1716_v22 = vadd.f32 %v4271_v6, %v1567_v30 }
 0x21e   : > { %2044 = vst.msk [vmem:[%s3567_s29 + $0x8] sm:$0xff] %vm699_vm1, %v2028_v45  ;;  %v2033_v44 = vadd.f32 %v3963_v58, %v2010_v3  ;;  %v2008_v7 = vadd.f32 %v1957_v40, %v1859_v38  ;;  %v1862_v61 = vadd.f32 %v2685_v10, %v1714_v54  ;;  %v4270_v54 = vld [vmem:[#allocation40_spill] sm:$0xff]  ;;  %v1570_v3 = vadd.f32 %v3937_v52, %v1421_v25 }
 0x21f   : > { %v1811_v15 = vpop.f32.mrf.mxu1  ;;  %v1960_v63 = vpop.f32.mrf.mxu0  ;;  %v1424_v45 = vadd.f32 %v4270_v54, %v1276_v32 }
 0x220   : > { %2049 = vst.msk [vmem:[%s3567_s29 + $0x30] sm:$0xff] %vm699_vm1, %v2033_v44  ;;  %v2031_v29 = vadd.f32 %v3963_v58, %v2008_v7  ;;  %v2011_v26 = vadd.f32 %v2709_v24, %v1862_v61  ;;  %v1860_v17 = vadd.f32 %v1811_v15, %v1712_v21  ;;  %v4272_v24 = vld [vmem:[#allocation42_spill] sm:$0xff]  ;;  %v4273_v21 = vld [vmem:[#allocation51_spill] sm:$0xff]  ;;  %v1719_v9 = vadd.f32 %v3939_v20, %v1570_v3 }
 0x221   : > { %v2688_v43 = vpop.f32.mrf.mxu1  ;;  %v2712_v48 = vpop.f32.mrf.mxu0  ;;  %v1422_v57 = vadd.f32 %v4272_v24, %v1274_v47  ;;  %v1721_v44 = vadd.f32 %v4273_v21, %v1572_v19  ;;  %v1573_v52 = vadd.f32 %v3943_v12, %v1424_v45 }
 0x222   : > { %2047 = vst.msk [vmem:[%s3567_s29 + $0x20] sm:$0xff] %vm699_vm1, %v2031_v29  ;;  %v2034_v16 = vadd.f32 %v3963_v58, %v2011_v26  ;;  %v2009_v36 = vadd.f32 %v1960_v63, %v1860_v17  ;;  %v1865_v35 = vadd.f32 %v2688_v43, %v1717_v34 }
 0x223   : > { %v1824_v55 = vpop.f32.mrf.mxu1  ;;  %v1973_v53 = vpop.f32.mrf.mxu0  ;;  %v1571_v34 = vadd.f32 %v3949_v60, %v1422_v57  ;;  %v1722_v29 = vadd.f32 %v3945_v56, %v1573_v52 }
 0x224   : > { %2050 = vst.msk [vmem:[%s3567_s29 + $0x38] sm:$0xff] %vm699_vm1, %v2034_v16  ;;  %v2032_v37 = vadd.f32 %v3963_v58, %v2009_v36  ;;  %v2014_v8 = vadd.f32 %v2712_v48, %v1865_v35  ;;  %v1863_v40 = vadd.f32 %v1824_v55, %v1715_v51 }
 0x225   : > { %v2689_v38 = vpop.f32.mrf.mxu1  ;;  %v2713_v59 = vpop.f32.mrf.mxu0  ;;  %v1720_v33 = vadd.f32 %v3951_v50, %v1571_v34 }
 0x226   : > { %2048 = vst.msk [vmem:[%s3567_s29 + $0x28] sm:$0xff] %vm699_vm1, %v2032_v37  ;;  %v2037_v14 = vadd.f32 %v3963_v58, %v2014_v8  ;;  %v2012_v49 = vadd.f32 %v1973_v53, %v1863_v40  ;;  %v1866_v10 = vadd.f32 %v2689_v38, %v1718_v4 }
 0x227   : > { %v1827_v7 = vpop.f32.mrf.mxu1  ;;  %v1976_v61 = vpop.f32.mrf.mxu0 }
 0x228   : > { %2053 = vst.msk [vmem:[%s3567_s29 + $0x50] sm:$0xff] %vm699_vm1, %v2037_v14  ;;  %v2035_v23 = vadd.f32 %v3963_v58, %v2012_v49  ;;  %v2015_v42 = vadd.f32 %v2713_v59, %v1866_v10  ;;  %v1864_v11 = vadd.f32 %v1827_v7, %v1716_v22 }
 0x229   : > { %v2692_v27 = vpop.f32.mrf.mxu1  ;;  %v2716_v13 = vpop.f32.mrf.mxu0 }
 0x22a   : > { %2051 = vst.msk [vmem:[%s3567_s29 + $0x40] sm:$0xff] %vm699_vm1, %v2035_v23  ;;  %v2038_v15 = vadd.f32 %v3963_v58, %v2015_v42  ;;  %v2013_v63 = vadd.f32 %v1976_v61, %v1864_v11  ;;  %v1869_v12 = vadd.f32 %v2692_v27, %v1721_v44 }
 0x22b   : > { %v1840_v28 = vpop.f32.mrf.mxu1  ;;  %v1989_v62 = vpop.f32.mrf.mxu0 }
 0x22c   : > { %2054 = vst.msk [vmem:[%s3567_s29 + $0x58] sm:$0xff] %vm699_vm1, %v2038_v15  ;;  %v2036_v20 = vadd.f32 %v3963_v58, %v2013_v63  ;;  %v2018_v26 = vadd.f32 %v2716_v13, %v1869_v12  ;;  %v1867_v60 = vadd.f32 %v1840_v28, %v1719_v9 }
 0x22d   : > { %v2693_v17 = vpop.f32.mrf.mxu1  ;;  %v2717_v1 = vpop.f32.mrf.mxu0 }
 0x22e   : > { %2052 = vst.msk [vmem:[%s3567_s29 + $0x48] sm:$0xff] %vm699_vm1, %v2036_v20  ;;  %v2041_v41 = vadd.f32 %v3963_v58, %v2018_v26  ;;  %v2016_v31 = vadd.f32 %v1989_v62, %v1867_v60  ;;  %v1870_v56 = vadd.f32 %v2693_v17, %v1722_v29 }
 0x22f   : > { %v1843_v32 = vpop.f32.mrf.mxu1  ;;  %v1992_v50 = vpop.f32.mrf.mxu0 }
 0x230   : > { %2057 = vst.msk [vmem:[%s3567_s29 + $0x70] sm:$0xff] %vm699_vm1, %v2041_v41  ;;  %v2039_v39 = vadd.f32 %v3963_v58, %v2016_v31  ;;  %v2019_v51 = vadd.f32 %v2717_v1, %v1870_v56  ;;  %v1868_v43 = vadd.f32 %v1843_v32, %v1720_v33 }
 0x232   : > { %2055 = vst.msk [vmem:[%s3567_s29 + $0x60] sm:$0xff] %vm699_vm1, %v2039_v39  ;;  %v2042_v48 = vadd.f32 %v3963_v58, %v2019_v51  ;;  %v2017_v18 = vadd.f32 %v1992_v50, %v1868_v43 }
 0x234   : > { %2058 = vst.msk [vmem:[%s3567_s29 + $0x78] sm:$0xff] %vm699_vm1, %v2042_v48  ;;  %v2040_v30 = vadd.f32 %v3963_v58, %v2017_v18 }
 0x236   : > { %2056 = vst.msk [vmem:[%s3567_s29 + $0x68] sm:$0xff] %vm699_vm1, %v2040_v30 }
 0x237   : > { %3048 = shalt.err (!%p3045_p9)
}
 0x238   : > { %s3049_s17 = scalar_lea.hbm %s4062_s27, 2048  ;;  %s3053_s15 = scalar_lea.hbm %s4276_s8, 8192 }
 0x239   : > { %p3050_p12 = scmp.ne.s32.totalorder %s4062_s27, %s3049_s17  ;;  %p3054_p1 = scmp.lt.s32.totalorder %s4062_s27, %s4276_s8 }
 0x23a   : > { %p3055_p4 = scmp.lt.s32.totalorder %s3053_s15, %s3049_s17 }
 0x23b   : > { %p3051_p5 = pnand %p3050_p12, %p4277_p8 }
 0x23c   : > { %p3056_p2 = por %p3055_p4, %p3054_p1 }
 0x23d   : > { %p3052_p7 = pneg %p3051_p5 }
 0x23f   : > { %p3057_p3 = pnand %p3056_p2, %p3052_p7 }
 0x241   : > { %3060 = shalt.err (!%p3057_p3)
}
 0x242   : > { %s3202_s0 = smov 128   ;;  %s3203_s21 = smov 8  }
 0x243   : > { %2736 = dma.vmem_to_hbm [thread:$0]  (%p4277_p8), %s4064_s7, 2048, %s4062_s27, %s2060_s1, %s3202_s0, %s3202_s0, %s3203_s21  }
 0x244 PF: > { %p2759_p0 = scmp.ge.s32.totalorder %s3191_s6, 2  ;;  %s2091_s4 = sand.u32 1, %s3163_s24  }
 0x245   : > { %p4278_p13 = scmp.ne.s32.totalorder %s4204_s16, 0  ;;  %s2092_s3 = scalar_lea.sflag [#allocation5], %s2091_s4 }
 0x247   : > { %p2753_p11 = pnand %p2759_p0, %p4278_p13 }
 0x249   : > { %p2754_p10 = pneg %p2753_p11 }
 0x24b   : > { %3134 = dma.done.wait (%p2754_p10), %s2092_s3, 2048  }
 0x24c   : > { %3136 = vsyncadd (%p2754_p10), %s2092_s3, 4294965248  ;;  %s25_s6 = sadd.s32 1, %s3191_s6   ;;  %s4280_s18 = sld [smem:[#allocation18_spill]] }
 0x24d   : > { %p4099_p6 = scmp.ge.s32.totalorder %s25_s6, 6   ;;  %s4281_s19 = sld [smem:[#allocation19_spill]] }
 0x24e   : > { %s4282_s23 = sld [smem:[#allocation20_spill]]  ;;  %s4291_s20 = smov %s4314_s12 }
 0x24f   : > { %s4283_s26 = sld [smem:[#allocation30_spill]]  ;;  %s4292_s21 = smov %s3155_s22 }
 0x250   : > { %s4284_s2 = sld [smem:[#allocation21_spill]]  ;;  %s4295_s24 = smov %s3167_s25 }
 0x251   : > { %s4285_s16 = sld [smem:[#allocation31_spill]] }
 0x252   : > { %s4286_s27 = sld [smem:[#allocation24_spill]] }
 0x253   : > { %s4287_s7 = sld [smem:[#allocation25_spill]] }
 0x254   : > { %s4288_s29 = sld [smem:[#allocation26_spill]]  ;;  %s4293_s22 = smov %s4282_s23 }
 0x255   : > { %s4289_s30 = sld [smem:[#allocation27_spill]]  ;;  %s4294_s23 = smov %s4283_s26 }
 0x256   : > { %s4296_s25 = smov %s4284_s2  ;;  %24 = sbr.rel (!%p4099_p6) target bundleno = 20 (0x14), region = 131 }
 0x257   : > { %s4297_s26 = smov %s4285_s16 }
 0x259   : > { %s4298_s28 = smov %s4287_s7 }
 0x25b   :  { %2097 = vsyncpa [#allocation4], 1 }
 0x25c   :  { %2099 = vsyncpa [#allocation4 + $0x1], 1 }
 0x25d   :  { %2100 = vsyncpa [#allocation7], 1 }
 0x25e   :  { %2102 = vsyncpa [#allocation7 + $0x1], 1 }
 0x25f   :  { %2103 = vsyncpa [#allocation10], 1 }
 0x260   :  { %2104 = vsyncpa [#allocation5], 1 }
 0x261   :  { %2106 = vsyncpa [#allocation5 + $0x1], 1 }

</bundles_post_ra>
